<compile_context>
chip_gen: v5e
topology: v5e:2x2
jax: 0.10.0
libtpu: 0.0.40
codegen_flags: <defaults>
</compile_context>

<pallas_src>
import functools

import jax
import jax.numpy as jnp
import numpy as np
from jax import lax
from jax.experimental import pallas as pl
from jax.experimental.pallas import tpu as pltpu

KSIZE = 7        # SpatialAttention kernel_size=7
PAD = 3          # padding=3
LANE = 128


def _round_up(v, m):
    return (v + m - 1) // m * m


# ----------------------------------------------------------------------------
# Pallas kernel: CBAM SpatialAttention map
#   sigmoid(conv7x7([mean_c(x), max_c(x)]))  ->  (N, 1, H*W)   (lane-dense)
# ----------------------------------------------------------------------------
def _conv_finalize(w_ref, masks_ref, o_ref, fpad_ref, avg, mx, *, HW, W, OFF, FP):
    """avg, mx: (1, HW) f32.  Writes sigmoid(conv7x7([avg, mx])) to o_ref."""
    # Flat zero-padded [avg, max] maps: only the two halo strips are zeroed
    # (once per image); the maps themselves are stored lane-dense at a
    # 128-aligned offset.
    fpad_ref[:, 0:OFF] = jnp.zeros((2, OFF), jnp.float32)
    fpad_ref[:, OFF + HW:FP] = jnp.zeros((2, FP - OFF - HW), jnp.float32)
    fpad_ref[0:1, OFF:OFF + HW] = avg
    fpad_ref[1:2, OFF:OFF + HW] = mx

    # Direct 7x7 conv in the flattened spatial domain: tap (ki, kj) is a
    # constant flat shift (ki-3)*W + (kj-3).  Rows out of range land in the
    # zero halos; columns out of range are killed by the per-kj column mask
    # (applied once per (ch, kj), not per tap).
    acc = jnp.zeros((1, HW), jnp.float32)
    for ch in range(2):
        for kj in range(KSIZE):
            colmask = masks_ref[kj:kj + 1, :]                       # (1, HW)
            part = jnp.zeros((1, HW), jnp.float32)
            for ki in range(KSIZE):
                w = w_ref[ch * KSIZE * KSIZE + ki * KSIZE + kj]     # SMEM scalar
                d = (ki - PAD) * W + (kj - PAD)
                part = part + w * fpad_ref[ch:ch + 1, OFF + d:OFF + d + HW]
            acc = acc + colmask * part
    o_ref[0, :, :] = jax.nn.sigmoid(acc).astype(o_ref.dtype)


def _sa_kernel(w_ref, x_ref, masks_ref, o_ref, fpad_ref, *acc_refs,
               C, TC, HW, W, OFF, FP, n_c):
    # ---- fused channel-sum / channel-max over the lane-dense (TC, HW) tile.
    # (8, HW) partial accumulators (one vreg-row group per step) are collapsed
    # once at the end -> no long serial FP dependency chain.
    if TC >= 8 and TC % 8 == 0:
        sp = None
        mp = None
        for s0 in range(0, TC, 8):
            blk = x_ref[0, s0:s0 + 8, :].astype(jnp.float32)        # (8, HW)
            sp = blk if sp is None else sp + blk
            mp = blk if mp is None else jnp.maximum(mp, blk)
        s = jnp.sum(sp, axis=0, keepdims=True)                      # (1, HW)
        m = jnp.max(mp, axis=0, keepdims=True)                      # (1, HW)
    else:
        s = x_ref[0, 0:1, :].astype(jnp.float32)
        m = s
        for t in range(1, TC):
            xt = x_ref[0, t:t + 1, :].astype(jnp.float32)
            s = s + xt
            m = jnp.maximum(m, xt)

    if n_c == 1:
        # Whole C in one tile: no reduction axis, no accumulator scratch.
        _conv_finalize(w_ref, masks_ref, o_ref, fpad_ref,
                       s * (1.0 / C), m, HW=HW, W=W, OFF=OFF, FP=FP)
    else:
        # Channel axis tiled as a grid reduction ("arbitrary").
        sum_ref, max_ref = acc_refs
        c = pl.program_id(1)

        @pl.when(c == 0)
        def _():
            sum_ref[...] = s
            max_ref[...] = m

        @pl.when(c > 0)
        def _():
            sum_ref[...] = sum_ref[...] + s
            max_ref[...] = jnp.maximum(max_ref[...], m)

        @pl.when(c == n_c - 1)
        def _():
            _conv_finalize(w_ref, masks_ref, o_ref, fpad_ref,
                           sum_ref[...] * (1.0 / C), max_ref[...],
                           HW=HW, W=W, OFF=OFF, FP=FP)


def spatial_attention(x, conv_w, *, vmem_budget_bytes=12 * 1024 * 1024):
    """x: (N, C, H, W); conv_w: (1, 2, 7, 7), no bias.  Returns (N, 1, H, W)."""
    N, C, H, W = x.shape
    HW = H * W
    itemsize = jnp.dtype(x.dtype).itemsize

    # Channel tile: cover all of C when the double-buffered lane-dense input
    # block fits a v7x-safe VMEM budget; otherwise the largest 8-multiple
    # divisor of C that fits (channel axis then becomes a grid reduction).
    candidates = [d for d in range(1, C + 1)
                  if C % d == 0 and (d % 8 == 0 or d == C)]
    fitting = [d for d in candidates if 2 * d * HW * itemsize <= vmem_budget_bytes]
    tc = max(fitting) if fitting else min(candidates)
    n_c = C // tc

    # Flat padded-map layout: map stored at 128-aligned OFF, halos of at least
    # 3*W+3 zeros on each side cover every (ki, kj) flat shift.
    OFF = _round_up(PAD * W + PAD, LANE)
    FP = _round_up(OFF + HW + PAD * W + PAD, LANE)

    # Lane-dense views of input / output.
    x_flat = x.reshape(N, C, HW)
    w_flat = conv_w.reshape(-1).astype(jnp.float32)          # (98,) SMEM prefetch

    # Per-kj column validity masks for the flat-domain conv (host precomputed).
    cols = np.arange(HW) % W
    masks = np.stack(
        [((cols + kj - PAD >= 0) & (cols + kj - PAD < W)).astype(np.float32)
         for kj in range(KSIZE)], axis=0)                    # (7, HW)
    masks = jnp.asarray(masks)

    kernel = functools.partial(_sa_kernel, C=C, TC=tc, HW=HW, W=W,
                               OFF=OFF, FP=FP, n_c=n_c)

    scratch = [pltpu.VMEM((2, FP), jnp.float32)]             # flat padded [avg, max]
    if n_c == 1:
        grid = (N,)
        x_spec = pl.BlockSpec((1, C, HW), lambda n, sref: (n, 0, 0))
        m_spec = pl.BlockSpec((KSIZE, HW), lambda n, sref: (0, 0))
        o_spec = pl.BlockSpec((1, 1, HW), lambda n, sref: (n, 0, 0))
        semantics = ("parallel",)
    else:
        grid = (N, n_c)
        x_spec = pl.BlockSpec((1, tc, HW), lambda n, c, sref: (n, c, 0))
        m_spec = pl.BlockSpec((KSIZE, HW), lambda n, c, sref: (0, 0))
        o_spec = pl.BlockSpec((1, 1, HW), lambda n, c, sref: (n, 0, 0))
        semantics = ("parallel", "arbitrary")
        scratch += [pltpu.VMEM((1, HW), jnp.float32),         # running channel sum
                    pltpu.VMEM((1, HW), jnp.float32)]         # running channel max

    # Honest VMEM bound: double-buffered blocks + (sublane-padded) scratch + headroom.
    vmem_bytes = int(2 * tc * HW * itemsize                   # input double-buffer
                     + 2 * KSIZE * HW * 4                     # column masks
                     + 2 * HW * itemsize                      # output double-buffer
                     + 8 * FP * 4                             # padded-map scratch
                     + (16 * HW * 4 if n_c > 1 else 0)        # sum/max scratch
                     + (4 << 20))                             # compiler headroom

    out = pl.pallas_call(
        kernel,
        out_shape=jax.ShapeDtypeStruct((N, 1, HW), x.dtype),
        grid_spec=pltpu.PrefetchScalarGridSpec(
            num_scalar_prefetch=1,
            grid=grid,
            in_specs=[x_spec, m_spec],
            out_specs=o_spec,
            scratch_shapes=scratch,
        ),
        compiler_params=pltpu.CompilerParams(
            dimension_semantics=semantics,
            vmem_limit_bytes=vmem_bytes,
        ),
    )(w_flat, x_flat, masks)
    return out.reshape(N, 1, H, W)


def spatial_attention_ref(x, conv_w):
    avg = jnp.mean(x, axis=1, keepdims=True)
    mx = jnp.max(x, axis=1, keepdims=True)
    feat = jnp.concatenate([avg, mx], axis=1)
    out = lax.conv_general_dilated(
        feat, conv_w, window_strides=(1, 1),
        padding=[(PAD, PAD), (PAD, PAD)],
        dimension_numbers=("NCHW", "OIHW", "NCHW"))
    return jax.nn.sigmoid(out)


# ----------------------------------------------------------------------------
# Rest of AHBF_cbam forward (plain JAX / XLA: 1x1 convs, BN, MLP, gating head)
# ----------------------------------------------------------------------------
def _batchnorm(x, gamma, beta, mean, var, eps=1e-5, axis=1):
    # TODO(synk): inference-mode BN (running stats); training-mode batch
    # statistics / running-stat updates are not implemented.
    shape = [1] * x.ndim
    shape[axis] = x.shape[axis]
    return ((x - mean.reshape(shape)) * gamma.reshape(shape)
            / jnp.sqrt(var.reshape(shape) + eps) + beta.reshape(shape))


def _channel_attention(x, fc1_w, fc2_w):
    w1 = fc1_w[:, :, 0, 0]                        # (C//r, C)
    w2 = fc2_w[:, :, 0, 0]                        # (C, C//r)
    avg = jnp.mean(x, axis=(2, 3))                # (B, C)
    mx = jnp.max(x, axis=(2, 3))                  # (B, C)

    def mlp(v):
        return jnp.maximum(v @ w1.T, 0.0) @ w2.T

    out = jax.nn.sigmoid(mlp(avg) + mlp(mx))      # (B, C)
    return out[:, :, None, None]


def ahbf_cbam_forward(params, x, y, logitx, logity, *, sa_fn):
    feasc = jnp.concatenate([x, y], axis=1)                        # (B, 2C, H, W)
    w1 = params["conv1_w"][:, :, 0, 0]                             # (C, 2C)
    feasc = (jnp.einsum("oi,bihw->bohw", w1, feasc)
             + params["conv1_b"][None, :, None, None])
    feasc = _batchnorm(feasc, params["bn1_gamma"], params["bn1_beta"],
                       params["bn1_mean"], params["bn1_var"])
    # CBAM
    ca = _channel_attention(feasc, params["ca_fc1_w"], params["ca_fc2_w"])
    out = feasc * ca
    sa = sa_fn(out, params["sa_conv_w"])                           # (B, 1, H, W)
    feasc = out * sa
    # gating head
    feas = jnp.mean(feasc, axis=(2, 3))                            # (B, C)
    feas = feas @ params["fc_w"].T + params["fc_b"]                # (B, 2)
    feas = _batchnorm(feas, params["bnv1_gamma"], params["bnv1_beta"],
                      params["bnv1_mean"], params["bnv1_var"])
    feas = jnp.maximum(feas, 0.0)
    feas = jax.nn.softmax(feas, axis=1)
    logit = feas[:, 0:1] * logitx + feas[:, 1:2] * logity
    return feasc, logit


def init_params(key, C):
    ks = jax.random.split(key, 12)

    def u(k, shape, fan_in):
        b = 1.0 / float(np.sqrt(fan_in))
        return jax.random.uniform(k, shape, jnp.float32, -b, b)

    return dict(
        conv1_w=u(ks[0], (C, 2 * C, 1, 1), 2 * C),
        conv1_b=u(ks[1], (C,), 2 * C),
        bn1_gamma=jnp.ones((C,), jnp.float32),
        bn1_beta=jnp.zeros((C,), jnp.float32),
        bn1_mean=0.1 * jax.random.normal(ks[2], (C,), jnp.float32),
        bn1_var=jax.random.uniform(ks[3], (C,), jnp.float32, 0.5, 1.5),
        ca_fc1_w=u(ks[4], (C // 16, C, 1, 1), C),
        ca_fc2_w=u(ks[5], (C, C // 16, 1, 1), C // 16),
        sa_conv_w=u(ks[6], (1, 2, KSIZE, KSIZE), 2 * KSIZE * KSIZE),
        fc_w=u(ks[7], (2, C), C),
        fc_b=u(ks[8], (2,), C),
        bnv1_gamma=jnp.ones((2,), jnp.float32),
        bnv1_beta=jnp.zeros((2,), jnp.float32),
        bnv1_mean=jnp.zeros((2,), jnp.float32),
        bnv1_var=jnp.ones((2,), jnp.float32),
    )


if __name__ == "__main__":
    key = jax.random.PRNGKey(0)
    kp, kx, ky, klx, kly = jax.random.split(key, 5)

    # CBAM(64) is hard-coded inside AHBF_cbam, so inchannel must be 64.
    N, C, H, W = 2, 64, 16, 16
    NUM_CLASSES = 10

    params = init_params(kp, C)
    x = jax.random.normal(kx, (N, C, H, W), jnp.float32)
    y = jax.random.normal(ky, (N, C, H, W), jnp.float32)
    logitx = jax.random.normal(klx, (N, NUM_CLASSES), jnp.float32)
    logity = jax.random.normal(kly, (N, NUM_CLASSES), jnp.float32)

    # Direct check of the Pallas spatial-attention kernel.
    sa_pallas = jax.block_until_ready(spatial_attention(x, params["sa_conv_w"]))
    sa_ref = spatial_attention_ref(x, params["sa_conv_w"])
    np.testing.assert_allclose(np.asarray(sa_pallas), np.asarray(sa_ref),
                               rtol=1e-5, atol=1e-5)

    # Full AHBF_cbam forward: Pallas-backed vs. pure-XLA reference.
    feasc, logit = ahbf_cbam_forward(params, x, y, logitx, logity,
                                     sa_fn=spatial_attention)
    feasc = jax.block_until_ready(feasc)
    logit = jax.block_until_ready(logit)

    feasc_ref, logit_ref = ahbf_cbam_forward(params, x, y, logitx, logity,
                                             sa_fn=spatial_attention_ref)
    np.testing.assert_allclose(np.asarray(feasc), np.asarray(feasc_ref),
                               rtol=1e-5, atol=1e-5)
    np.testing.assert_allclose(np.asarray(logit), np.asarray(logit_ref),
                               rtol=1e-5, atol=1e-5)

    print("KERNEL_OK")
</pallas_src>

<mosaic_0001>
module attributes {stable_mosaic.version = 11 : i64} {
  func.func @_sa_kernel(%arg0: i32, %arg1: memref<98xf32, #tpu.memory_space<smem>>, %arg2: memref<1x64x256xf32, #tpu.memory_space<vmem>>, %arg3: memref<7x256xf32, #tpu.memory_space<vmem>>, %arg4: memref<1x1x256xf32, #tpu.memory_space<vmem>>, %arg5: memref<2x512xf32, #tpu.memory_space<vmem>>) attributes {dimension_semantics = [#tpu.dimension_semantics<parallel>], iteration_bounds = array<i64: 2>, scalar_prefetch = 1 : i64, scratch_operands = 1 : i64, tpu.core_type = #tpu.core_type<tc>, window_params = [{transform_indices = @transform_0, window_bounds = array<i64: 1, 64, 256>}, {pipeline_mode = #tpu.pipeline_mode<synchronous>, transform_indices = @transform_1, window_bounds = array<i64: 7, 256>}, {transform_indices = @transform_2, window_bounds = array<i64: 1, 1, 256>}]} {
    %c0 = arith.constant 0 : index
    %c0_0 = arith.constant 0 : index
    %c0_1 = arith.constant 0 : index
    %0 = vector.load %arg2[%c0, %c0_0, %c0_1] : memref<1x64x256xf32, #tpu.memory_space<vmem>>, vector<1x8x256xf32>
    %1 = vector.shape_cast %0 : vector<1x8x256xf32> to vector<8x256xf32>
    %c0_2 = arith.constant 0 : index
    %c8 = arith.constant 8 : index
    %c0_3 = arith.constant 0 : index
    %2 = vector.load %arg2[%c0_2, %c8, %c0_3] : memref<1x64x256xf32, #tpu.memory_space<vmem>>, vector<1x8x256xf32>
    %3 = vector.shape_cast %2 : vector<1x8x256xf32> to vector<8x256xf32>
    %4 = arith.addf %1, %3 : vector<8x256xf32>
    %5 = arith.maximumf %1, %3 : vector<8x256xf32>
    %c0_4 = arith.constant 0 : index
    %c16 = arith.constant 16 : index
    %c0_5 = arith.constant 0 : index
    %6 = vector.load %arg2[%c0_4, %c16, %c0_5] : memref<1x64x256xf32, #tpu.memory_space<vmem>>, vector<1x8x256xf32>
    %7 = vector.shape_cast %6 : vector<1x8x256xf32> to vector<8x256xf32>
    %8 = arith.addf %4, %7 : vector<8x256xf32>
    %9 = arith.maximumf %5, %7 : vector<8x256xf32>
    %c0_6 = arith.constant 0 : index
    %c24 = arith.constant 24 : index
    %c0_7 = arith.constant 0 : index
    %10 = vector.load %arg2[%c0_6, %c24, %c0_7] : memref<1x64x256xf32, #tpu.memory_space<vmem>>, vector<1x8x256xf32>
    %11 = vector.shape_cast %10 : vector<1x8x256xf32> to vector<8x256xf32>
    %12 = arith.addf %8, %11 : vector<8x256xf32>
    %13 = arith.maximumf %9, %11 : vector<8x256xf32>
    %c0_8 = arith.constant 0 : index
    %c32 = arith.constant 32 : index
    %c0_9 = arith.constant 0 : index
    %14 = vector.load %arg2[%c0_8, %c32, %c0_9] : memref<1x64x256xf32, #tpu.memory_space<vmem>>, vector<1x8x256xf32>
    %15 = vector.shape_cast %14 : vector<1x8x256xf32> to vector<8x256xf32>
    %16 = arith.addf %12, %15 : vector<8x256xf32>
    %17 = arith.maximumf %13, %15 : vector<8x256xf32>
    %c0_10 = arith.constant 0 : index
    %c40 = arith.constant 40 : index
    %c0_11 = arith.constant 0 : index
    %18 = vector.load %arg2[%c0_10, %c40, %c0_11] : memref<1x64x256xf32, #tpu.memory_space<vmem>>, vector<1x8x256xf32>
    %19 = vector.shape_cast %18 : vector<1x8x256xf32> to vector<8x256xf32>
    %20 = arith.addf %16, %19 : vector<8x256xf32>
    %21 = arith.maximumf %17, %19 : vector<8x256xf32>
    %c0_12 = arith.constant 0 : index
    %c48 = arith.constant 48 : index
    %c0_13 = arith.constant 0 : index
    %22 = vector.load %arg2[%c0_12, %c48, %c0_13] : memref<1x64x256xf32, #tpu.memory_space<vmem>>, vector<1x8x256xf32>
    %23 = vector.shape_cast %22 : vector<1x8x256xf32> to vector<8x256xf32>
    %24 = arith.addf %20, %23 : vector<8x256xf32>
    %25 = arith.maximumf %21, %23 : vector<8x256xf32>
    %c0_14 = arith.constant 0 : index
    %c56 = arith.constant 56 : index
    %c0_15 = arith.constant 0 : index
    %26 = vector.load %arg2[%c0_14, %c56, %c0_15] : memref<1x64x256xf32, #tpu.memory_space<vmem>>, vector<1x8x256xf32>
    %27 = vector.shape_cast %26 : vector<1x8x256xf32> to vector<8x256xf32>
    %28 = arith.addf %24, %27 : vector<8x256xf32>
    %29 = arith.maximumf %25, %27 : vector<8x256xf32>
    %cst = arith.constant dense<0.000000e+00> : vector<256xf32>
    %30 = vector.multi_reduction <add>, %28, %cst [0] : vector<8x256xf32> to vector<256xf32>
    %31 = vector.shape_cast %30 : vector<256xf32> to vector<1x256xf32>
    %cst_16 = arith.constant dense<0xFF800000> : vector<256xf32>
    %32 = vector.multi_reduction <maximumf>, %29, %cst_16 [0] : vector<8x256xf32> to vector<256xf32>
    %33 = vector.shape_cast %32 : vector<256xf32> to vector<1x256xf32>
    %cst_17 = arith.constant 1.562500e-02 : f32
    %34 = vector.broadcast %cst_17 : f32 to vector<1x256xf32>
    %35 = arith.mulf %31, %34 : vector<1x256xf32>
    %cst_18 = arith.constant 0.000000e+00 : f32
    %36 = vector.broadcast %cst_18 : f32 to vector<2x128xf32>
    %c0_19 = arith.constant 0 : index
    %c0_20 = arith.constant 0 : index
    %37 = vector.load %arg5[%c0_19, %c0_20] : memref<2x512xf32, #tpu.memory_space<vmem>>, vector<2x128xf32>
    tpu.vector_store %arg5[%c0_19, %c0_20], %36 {strides = array<i32>} : memref<2x512xf32, #tpu.memory_space<vmem>>, vector<2x128xf32>,
    %cst_21 = arith.constant 0.000000e+00 : f32
    %38 = vector.broadcast %cst_21 : f32 to vector<2x128xf32>
    %c0_22 = arith.constant 0 : index
    %c384 = arith.constant 384 : index
    %39 = vector.load %arg5[%c0_22, %c384] : memref<2x512xf32, #tpu.memory_space<vmem>>, vector<2x128xf32>
    tpu.vector_store %arg5[%c0_22, %c384], %38 {strides = array<i32>} : memref<2x512xf32, #tpu.memory_space<vmem>>, vector<2x128xf32>,
    %c0_23 = arith.constant 0 : index
    %c128 = arith.constant 128 : index
    %40 = vector.load %arg5[%c0_23, %c128] : memref<2x512xf32, #tpu.memory_space<vmem>>, vector<1x256xf32>
    tpu.vector_store %arg5[%c0_23, %c128], %35 {strides = array<i32>} : memref<2x512xf32, #tpu.memory_space<vmem>>, vector<1x256xf32>,
    %c1 = arith.constant 1 : index
    %c128_24 = arith.constant 128 : index
    %41 = vector.load %arg5[%c1, %c128_24] : memref<2x512xf32, #tpu.memory_space<vmem>>, vector<1x256xf32>
    tpu.vector_store %arg5[%c1, %c128_24], %33 {strides = array<i32>} : memref<2x512xf32, #tpu.memory_space<vmem>>, vector<1x256xf32>,
    %cst_25 = arith.constant 0.000000e+00 : f32
    %42 = vector.broadcast %cst_25 : f32 to vector<1x256xf32>
    %c0_26 = arith.constant 0 : index
    %c0_27 = arith.constant 0 : index
    %43 = vector.load %arg3[%c0_26, %c0_27] : memref<7x256xf32, #tpu.memory_space<vmem>>, vector<1x256xf32>
    %cst_28 = arith.constant 0.000000e+00 : f32
    %44 = vector.broadcast %cst_28 : f32 to vector<1x256xf32>
    %c0_29 = arith.constant 0 : index
    %45 = memref.load %arg1[%c0_29] : memref<98xf32, #tpu.memory_space<smem>>
    %c0_30 = arith.constant 0 : index
    %c77 = arith.constant 77 : index
    %46 = vector.load %arg5[%c0_30, %c77] : memref<2x512xf32, #tpu.memory_space<vmem>>, vector<1x256xf32>
    %47 = vector.broadcast %45 : f32 to vector<1x256xf32>
    %48 = arith.mulf %47, %46 : vector<1x256xf32>
    %49 = arith.addf %44, %48 : vector<1x256xf32>
    %c7 = arith.constant 7 : index
    %50 = memref.load %arg1[%c7] : memref<98xf32, #tpu.memory_space<smem>>
    %c0_31 = arith.constant 0 : index
    %c93 = arith.constant 93 : index
    %51 = vector.load %arg5[%c0_31, %c93] : memref<2x512xf32, #tpu.memory_space<vmem>>, vector<1x256xf32>
    %52 = vector.broadcast %50 : f32 to vector<1x256xf32>
    %53 = arith.mulf %52, %51 : vector<1x256xf32>
    %54 = arith.addf %49, %53 : vector<1x256xf32>
    %c14 = arith.constant 14 : index
    %55 = memref.load %arg1[%c14] : memref<98xf32, #tpu.memory_space<smem>>
    %c0_32 = arith.constant 0 : index
    %c109 = arith.constant 109 : index
    %56 = vector.load %arg5[%c0_32, %c109] : memref<2x512xf32, #tpu.memory_space<vmem>>, vector<1x256xf32>
    %57 = vector.broadcast %55 : f32 to vector<1x256xf32>
    %58 = arith.mulf %57, %56 : vector<1x256xf32>
    %59 = arith.addf %54, %58 : vector<1x256xf32>
    %c21 = arith.constant 21 : index
    %60 = memref.load %arg1[%c21] : memref<98xf32, #tpu.memory_space<smem>>
    %c0_33 = arith.constant 0 : index
    %c125 = arith.constant 125 : index
    %61 = vector.load %arg5[%c0_33, %c125] : memref<2x512xf32, #tpu.memory_space<vmem>>, vector<1x256xf32>
    %62 = vector.broadcast %60 : f32 to vector<1x256xf32>
    %63 = arith.mulf %62, %61 : vector<1x256xf32>
    %64 = arith.addf %59, %63 : vector<1x256xf32>
    %c28 = arith.constant 28 : index
    %65 = memref.load %arg1[%c28] : memref<98xf32, #tpu.memory_space<smem>>
    %c0_34 = arith.constant 0 : index
    %c141 = arith.constant 141 : index
    %66 = vector.load %arg5[%c0_34, %c141] : memref<2x512xf32, #tpu.memory_space<vmem>>, vector<1x256xf32>
    %67 = vector.broadcast %65 : f32 to vector<1x256xf32>
    %68 = arith.mulf %67, %66 : vector<1x256xf32>
    %69 = arith.addf %64, %68 : vector<1x256xf32>
    %c35 = arith.constant 35 : index
    %70 = memref.load %arg1[%c35] : memref<98xf32, #tpu.memory_space<smem>>
    %c0_35 = arith.constant 0 : index
    %c157 = arith.constant 157 : index
    %71 = vector.load %arg5[%c0_35, %c157] : memref<2x512xf32, #tpu.memory_space<vmem>>, vector<1x256xf32>
    %72 = vector.broadcast %70 : f32 to vector<1x256xf32>
    %73 = arith.mulf %72, %71 : vector<1x256xf32>
    %74 = arith.addf %69, %73 : vector<1x256xf32>
    %c42 = arith.constant 42 : index
    %75 = memref.load %arg1[%c42] : memref<98xf32, #tpu.memory_space<smem>>
    %c0_36 = arith.constant 0 : index
    %c173 = arith.constant 173 : index
    %76 = vector.load %arg5[%c0_36, %c173] : memref<2x512xf32, #tpu.memory_space<vmem>>, vector<1x256xf32>
    %77 = vector.broadcast %75 : f32 to vector<1x256xf32>
    %78 = arith.mulf %77, %76 : vector<1x256xf32>
    %79 = arith.addf %74, %78 : vector<1x256xf32>
    %80 = arith.mulf %43, %79 : vector<1x256xf32>
    %81 = arith.addf %42, %80 : vector<1x256xf32>
    %c1_37 = arith.constant 1 : index
    %c0_38 = arith.constant 0 : index
    %82 = vector.load %arg3[%c1_37, %c0_38] : memref<7x256xf32, #tpu.memory_space<vmem>>, vector<1x256xf32>
    %cst_39 = arith.constant 0.000000e+00 : f32
    %83 = vector.broadcast %cst_39 : f32 to vector<1x256xf32>
    %c1_40 = arith.constant 1 : index
    %84 = memref.load %arg1[%c1_40] : memref<98xf32, #tpu.memory_space<smem>>
    %c0_41 = arith.constant 0 : index
    %c78 = arith.constant 78 : index
    %85 = vector.load %arg5[%c0_41, %c78] : memref<2x512xf32, #tpu.memory_space<vmem>>, vector<1x256xf32>
    %86 = vector.broadcast %84 : f32 to vector<1x256xf32>
    %87 = arith.mulf %86, %85 : vector<1x256xf32>
    %88 = arith.addf %83, %87 : vector<1x256xf32>
    %c8_42 = arith.constant 8 : index
    %89 = memref.load %arg1[%c8_42] : memref<98xf32, #tpu.memory_space<smem>>
    %c0_43 = arith.constant 0 : index
    %c94 = arith.constant 94 : index
    %90 = vector.load %arg5[%c0_43, %c94] : memref<2x512xf32, #tpu.memory_space<vmem>>, vector<1x256xf32>
    %91 = vector.broadcast %89 : f32 to vector<1x256xf32>
    %92 = arith.mulf %91, %90 : vector<1x256xf32>
    %93 = arith.addf %88, %92 : vector<1x256xf32>
    %c15 = arith.constant 15 : index
    %94 = memref.load %arg1[%c15] : memref<98xf32, #tpu.memory_space<smem>>
    %c0_44 = arith.constant 0 : index
    %c110 = arith.constant 110 : index
    %95 = vector.load %arg5[%c0_44, %c110] : memref<2x512xf32, #tpu.memory_space<vmem>>, vector<1x256xf32>
    %96 = vector.broadcast %94 : f32 to vector<1x256xf32>
    %97 = arith.mulf %96, %95 : vector<1x256xf32>
    %98 = arith.addf %93, %97 : vector<1x256xf32>
    %c22 = arith.constant 22 : index
    %99 = memref.load %arg1[%c22] : memref<98xf32, #tpu.memory_space<smem>>
    %c0_45 = arith.constant 0 : index
    %c126 = arith.constant 126 : index
    %100 = vector.load %arg5[%c0_45, %c126] : memref<2x512xf32, #tpu.memory_space<vmem>>, vector<1x256xf32>
    %101 = vector.broadcast %99 : f32 to vector<1x256xf32>
    %102 = arith.mulf %101, %100 : vector<1x256xf32>
    %103 = arith.addf %98, %102 : vector<1x256xf32>
    %c29 = arith.constant 29 : index
    %104 = memref.load %arg1[%c29] : memref<98xf32, #tpu.memory_space<smem>>
    %c0_46 = arith.constant 0 : index
    %c142 = arith.constant 142 : index
    %105 = vector.load %arg5[%c0_46, %c142] : memref<2x512xf32, #tpu.memory_space<vmem>>, vector<1x256xf32>
    %106 = vector.broadcast %104 : f32 to vector<1x256xf32>
    %107 = arith.mulf %106, %105 : vector<1x256xf32>
    %108 = arith.addf %103, %107 : vector<1x256xf32>
    %c36 = arith.constant 36 : index
    %109 = memref.load %arg1[%c36] : memref<98xf32, #tpu.memory_space<smem>>
    %c0_47 = arith.constant 0 : index
    %c158 = arith.constant 158 : index
    %110 = vector.load %arg5[%c0_47, %c158] : memref<2x512xf32, #tpu.memory_space<vmem>>, vector<1x256xf32>
    %111 = vector.broadcast %109 : f32 to vector<1x256xf32>
    %112 = arith.mulf %111, %110 : vector<1x256xf32>
    %113 = arith.addf %108, %112 : vector<1x256xf32>
    %c43 = arith.constant 43 : index
    %114 = memref.load %arg1[%c43] : memref<98xf32, #tpu.memory_space<smem>>
    %c0_48 = arith.constant 0 : index
    %c174 = arith.constant 174 : index
    %115 = vector.load %arg5[%c0_48, %c174] : memref<2x512xf32, #tpu.memory_space<vmem>>, vector<1x256xf32>
    %116 = vector.broadcast %114 : f32 to vector<1x256xf32>
    %117 = arith.mulf %116, %115 : vector<1x256xf32>
    %118 = arith.addf %113, %117 : vector<1x256xf32>
    %119 = arith.mulf %82, %118 : vector<1x256xf32>
    %120 = arith.addf %81, %119 : vector<1x256xf32>
    %c2 = arith.constant 2 : index
    %c0_49 = arith.constant 0 : index
    %121 = vector.load %arg3[%c2, %c0_49] : memref<7x256xf32, #tpu.memory_space<vmem>>, vector<1x256xf32>
    %cst_50 = arith.constant 0.000000e+00 : f32
    %122 = vector.broadcast %cst_50 : f32 to vector<1x256xf32>
    %c2_51 = arith.constant 2 : index
    %123 = memref.load %arg1[%c2_51] : memref<98xf32, #tpu.memory_space<smem>>
    %c0_52 = arith.constant 0 : index
    %c79 = arith.constant 79 : index
    %124 = vector.load %arg5[%c0_52, %c79] : memref<2x512xf32, #tpu.memory_space<vmem>>, vector<1x256xf32>
    %125 = vector.broadcast %123 : f32 to vector<1x256xf32>
    %126 = arith.mulf %125, %124 : vector<1x256xf32>
    %127 = arith.addf %122, %126 : vector<1x256xf32>
    %c9 = arith.constant 9 : index
    %128 = memref.load %arg1[%c9] : memref<98xf32, #tpu.memory_space<smem>>
    %c0_53 = arith.constant 0 : index
    %c95 = arith.constant 95 : index
    %129 = vector.load %arg5[%c0_53, %c95] : memref<2x512xf32, #tpu.memory_space<vmem>>, vector<1x256xf32>
    %130 = vector.broadcast %128 : f32 to vector<1x256xf32>
    %131 = arith.mulf %130, %129 : vector<1x256xf32>
    %132 = arith.addf %127, %131 : vector<1x256xf32>
    %c16_54 = arith.constant 16 : index
    %133 = memref.load %arg1[%c16_54] : memref<98xf32, #tpu.memory_space<smem>>
    %c0_55 = arith.constant 0 : index
    %c111 = arith.constant 111 : index
    %134 = vector.load %arg5[%c0_55, %c111] : memref<2x512xf32, #tpu.memory_space<vmem>>, vector<1x256xf32>
    %135 = vector.broadcast %133 : f32 to vector<1x256xf32>
    %136 = arith.mulf %135, %134 : vector<1x256xf32>
    %137 = arith.addf %132, %136 : vector<1x256xf32>
    %c23 = arith.constant 23 : index
    %138 = memref.load %arg1[%c23] : memref<98xf32, #tpu.memory_space<smem>>
    %c0_56 = arith.constant 0 : index
    %c127 = arith.constant 127 : index
    %139 = vector.load %arg5[%c0_56, %c127] : memref<2x512xf32, #tpu.memory_space<vmem>>, vector<1x256xf32>
    %140 = vector.broadcast %138 : f32 to vector<1x256xf32>
    %141 = arith.mulf %140, %139 : vector<1x256xf32>
    %142 = arith.addf %137, %141 : vector<1x256xf32>
    %c30 = arith.constant 30 : index
    %143 = memref.load %arg1[%c30] : memref<98xf32, #tpu.memory_space<smem>>
    %c0_57 = arith.constant 0 : index
    %c143 = arith.constant 143 : index
    %144 = vector.load %arg5[%c0_57, %c143] : memref<2x512xf32, #tpu.memory_space<vmem>>, vector<1x256xf32>
    %145 = vector.broadcast %143 : f32 to vector<1x256xf32>
    %146 = arith.mulf %145, %144 : vector<1x256xf32>
    %147 = arith.addf %142, %146 : vector<1x256xf32>
    %c37 = arith.constant 37 : index
    %148 = memref.load %arg1[%c37] : memref<98xf32, #tpu.memory_space<smem>>
    %c0_58 = arith.constant 0 : index
    %c159 = arith.constant 159 : index
    %149 = vector.load %arg5[%c0_58, %c159] : memref<2x512xf32, #tpu.memory_space<vmem>>, vector<1x256xf32>
    %150 = vector.broadcast %148 : f32 to vector<1x256xf32>
    %151 = arith.mulf %150, %149 : vector<1x256xf32>
    %152 = arith.addf %147, %151 : vector<1x256xf32>
    %c44 = arith.constant 44 : index
    %153 = memref.load %arg1[%c44] : memref<98xf32, #tpu.memory_space<smem>>
    %c0_59 = arith.constant 0 : index
    %c175 = arith.constant 175 : index
    %154 = vector.load %arg5[%c0_59, %c175] : memref<2x512xf32, #tpu.memory_space<vmem>>, vector<1x256xf32>
    %155 = vector.broadcast %153 : f32 to vector<1x256xf32>
    %156 = arith.mulf %155, %154 : vector<1x256xf32>
    %157 = arith.addf %152, %156 : vector<1x256xf32>
    %158 = arith.mulf %121, %157 : vector<1x256xf32>
    %159 = arith.addf %120, %158 : vector<1x256xf32>
    %c3 = arith.constant 3 : index
    %c0_60 = arith.constant 0 : index
    %160 = vector.load %arg3[%c3, %c0_60] : memref<7x256xf32, #tpu.memory_space<vmem>>, vector<1x256xf32>
    %cst_61 = arith.constant 0.000000e+00 : f32
    %161 = vector.broadcast %cst_61 : f32 to vector<1x256xf32>
    %c3_62 = arith.constant 3 : index
    %162 = memref.load %arg1[%c3_62] : memref<98xf32, #tpu.memory_space<smem>>
    %c0_63 = arith.constant 0 : index
    %c80 = arith.constant 80 : index
    %163 = vector.load %arg5[%c0_63, %c80] : memref<2x512xf32, #tpu.memory_space<vmem>>, vector<1x256xf32>
    %164 = vector.broadcast %162 : f32 to vector<1x256xf32>
    %165 = arith.mulf %164, %163 : vector<1x256xf32>
    %166 = arith.addf %161, %165 : vector<1x256xf32>
    %c10 = arith.constant 10 : index
    %167 = memref.load %arg1[%c10] : memref<98xf32, #tpu.memory_space<smem>>
    %c0_64 = arith.constant 0 : index
    %c96 = arith.constant 96 : index
    %168 = vector.load %arg5[%c0_64, %c96] : memref<2x512xf32, #tpu.memory_space<vmem>>, vector<1x256xf32>
    %169 = vector.broadcast %167 : f32 to vector<1x256xf32>
    %170 = arith.mulf %169, %168 : vector<1x256xf32>
    %171 = arith.addf %166, %170 : vector<1x256xf32>
    %c17 = arith.constant 17 : index
    %172 = memref.load %arg1[%c17] : memref<98xf32, #tpu.memory_space<smem>>
    %c0_65 = arith.constant 0 : index
    %c112 = arith.constant 112 : index
    %173 = vector.load %arg5[%c0_65, %c112] : memref<2x512xf32, #tpu.memory_space<vmem>>, vector<1x256xf32>
    %174 = vector.broadcast %172 : f32 to vector<1x256xf32>
    %175 = arith.mulf %174, %173 : vector<1x256xf32>
    %176 = arith.addf %171, %175 : vector<1x256xf32>
    %c24_66 = arith.constant 24 : index
    %177 = memref.load %arg1[%c24_66] : memref<98xf32, #tpu.memory_space<smem>>
    %c0_67 = arith.constant 0 : index
    %c128_68 = arith.constant 128 : index
    %178 = vector.load %arg5[%c0_67, %c128_68] : memref<2x512xf32, #tpu.memory_space<vmem>>, vector<1x256xf32>
    %179 = vector.broadcast %177 : f32 to vector<1x256xf32>
    %180 = arith.mulf %179, %178 : vector<1x256xf32>
    %181 = arith.addf %176, %180 : vector<1x256xf32>
    %c31 = arith.constant 31 : index
    %182 = memref.load %arg1[%c31] : memref<98xf32, #tpu.memory_space<smem>>
    %c0_69 = arith.constant 0 : index
    %c144 = arith.constant 144 : index
    %183 = vector.load %arg5[%c0_69, %c144] : memref<2x512xf32, #tpu.memory_space<vmem>>, vector<1x256xf32>
    %184 = vector.broadcast %182 : f32 to vector<1x256xf32>
    %185 = arith.mulf %184, %183 : vector<1x256xf32>
    %186 = arith.addf %181, %185 : vector<1x256xf32>
    %c38 = arith.constant 38 : index
    %187 = memref.load %arg1[%c38] : memref<98xf32, #tpu.memory_space<smem>>
    %c0_70 = arith.constant 0 : index
    %c160 = arith.constant 160 : index
    %188 = vector.load %arg5[%c0_70, %c160] : memref<2x512xf32, #tpu.memory_space<vmem>>, vector<1x256xf32>
    %189 = vector.broadcast %187 : f32 to vector<1x256xf32>
    %190 = arith.mulf %189, %188 : vector<1x256xf32>
    %191 = arith.addf %186, %190 : vector<1x256xf32>
    %c45 = arith.constant 45 : index
    %192 = memref.load %arg1[%c45] : memref<98xf32, #tpu.memory_space<smem>>
    %c0_71 = arith.constant 0 : index
    %c176 = arith.constant 176 : index
    %193 = vector.load %arg5[%c0_71, %c176] : memref<2x512xf32, #tpu.memory_space<vmem>>, vector<1x256xf32>
    %194 = vector.broadcast %192 : f32 to vector<1x256xf32>
    %195 = arith.mulf %194, %193 : vector<1x256xf32>
    %196 = arith.addf %191, %195 : vector<1x256xf32>
    %197 = arith.mulf %160, %196 : vector<1x256xf32>
    %198 = arith.addf %159, %197 : vector<1x256xf32>
    %c4 = arith.constant 4 : index
    %c0_72 = arith.constant 0 : index
    %199 = vector.load %arg3[%c4, %c0_72] : memref<7x256xf32, #tpu.memory_space<vmem>>, vector<1x256xf32>
    %cst_73 = arith.constant 0.000000e+00 : f32
    %200 = vector.broadcast %cst_73 : f32 to vector<1x256xf32>
    %c4_74 = arith.constant 4 : index
    %201 = memref.load %arg1[%c4_74] : memref<98xf32, #tpu.memory_space<smem>>
    %c0_75 = arith.constant 0 : index
    %c81 = arith.constant 81 : index
    %202 = vector.load %arg5[%c0_75, %c81] : memref<2x512xf32, #tpu.memory_space<vmem>>, vector<1x256xf32>
    %203 = vector.broadcast %201 : f32 to vector<1x256xf32>
    %204 = arith.mulf %203, %202 : vector<1x256xf32>
    %205 = arith.addf %200, %204 : vector<1x256xf32>
    %c11 = arith.constant 11 : index
    %206 = memref.load %arg1[%c11] : memref<98xf32, #tpu.memory_space<smem>>
    %c0_76 = arith.constant 0 : index
    %c97 = arith.constant 97 : index
    %207 = vector.load %arg5[%c0_76, %c97] : memref<2x512xf32, #tpu.memory_space<vmem>>, vector<1x256xf32>
    %208 = vector.broadcast %206 : f32 to vector<1x256xf32>
    %209 = arith.mulf %208, %207 : vector<1x256xf32>
    %210 = arith.addf %205, %209 : vector<1x256xf32>
    %c18 = arith.constant 18 : index
    %211 = memref.load %arg1[%c18] : memref<98xf32, #tpu.memory_space<smem>>
    %c0_77 = arith.constant 0 : index
    %c113 = arith.constant 113 : index
    %212 = vector.load %arg5[%c0_77, %c113] : memref<2x512xf32, #tpu.memory_space<vmem>>, vector<1x256xf32>
    %213 = vector.broadcast %211 : f32 to vector<1x256xf32>
    %214 = arith.mulf %213, %212 : vector<1x256xf32>
    %215 = arith.addf %210, %214 : vector<1x256xf32>
    %c25 = arith.constant 25 : index
    %216 = memref.load %arg1[%c25] : memref<98xf32, #tpu.memory_space<smem>>
    %c0_78 = arith.constant 0 : index
    %c129 = arith.constant 129 : index
    %217 = vector.load %arg5[%c0_78, %c129] : memref<2x512xf32, #tpu.memory_space<vmem>>, vector<1x256xf32>
    %218 = vector.broadcast %216 : f32 to vector<1x256xf32>
    %219 = arith.mulf %218, %217 : vector<1x256xf32>
    %220 = arith.addf %215, %219 : vector<1x256xf32>
    %c32_79 = arith.constant 32 : index
    %221 = memref.load %arg1[%c32_79] : memref<98xf32, #tpu.memory_space<smem>>
    %c0_80 = arith.constant 0 : index
    %c145 = arith.constant 145 : index
    %222 = vector.load %arg5[%c0_80, %c145] : memref<2x512xf32, #tpu.memory_space<vmem>>, vector<1x256xf32>
    %223 = vector.broadcast %221 : f32 to vector<1x256xf32>
    %224 = arith.mulf %223, %222 : vector<1x256xf32>
    %225 = arith.addf %220, %224 : vector<1x256xf32>
    %c39 = arith.constant 39 : index
    %226 = memref.load %arg1[%c39] : memref<98xf32, #tpu.memory_space<smem>>
    %c0_81 = arith.constant 0 : index
    %c161 = arith.constant 161 : index
    %227 = vector.load %arg5[%c0_81, %c161] : memref<2x512xf32, #tpu.memory_space<vmem>>, vector<1x256xf32>
    %228 = vector.broadcast %226 : f32 to vector<1x256xf32>
    %229 = arith.mulf %228, %227 : vector<1x256xf32>
    %230 = arith.addf %225, %229 : vector<1x256xf32>
    %c46 = arith.constant 46 : index
    %231 = memref.load %arg1[%c46] : memref<98xf32, #tpu.memory_space<smem>>
    %c0_82 = arith.constant 0 : index
    %c177 = arith.constant 177 : index
    %232 = vector.load %arg5[%c0_82, %c177] : memref<2x512xf32, #tpu.memory_space<vmem>>, vector<1x256xf32>
    %233 = vector.broadcast %231 : f32 to vector<1x256xf32>
    %234 = arith.mulf %233, %232 : vector<1x256xf32>
    %235 = arith.addf %230, %234 : vector<1x256xf32>
    %236 = arith.mulf %199, %235 : vector<1x256xf32>
    %237 = arith.addf %198, %236 : vector<1x256xf32>
    %c5 = arith.constant 5 : index
    %c0_83 = arith.constant 0 : index
    %238 = vector.load %arg3[%c5, %c0_83] : memref<7x256xf32, #tpu.memory_space<vmem>>, vector<1x256xf32>
    %cst_84 = arith.constant 0.000000e+00 : f32
    %239 = vector.broadcast %cst_84 : f32 to vector<1x256xf32>
    %c5_85 = arith.constant 5 : index
    %240 = memref.load %arg1[%c5_85] : memref<98xf32, #tpu.memory_space<smem>>
    %c0_86 = arith.constant 0 : index
    %c82 = arith.constant 82 : index
    %241 = vector.load %arg5[%c0_86, %c82] : memref<2x512xf32, #tpu.memory_space<vmem>>, vector<1x256xf32>
    %242 = vector.broadcast %240 : f32 to vector<1x256xf32>
    %243 = arith.mulf %242, %241 : vector<1x256xf32>
    %244 = arith.addf %239, %243 : vector<1x256xf32>
    %c12 = arith.constant 12 : index
    %245 = memref.load %arg1[%c12] : memref<98xf32, #tpu.memory_space<smem>>
    %c0_87 = arith.constant 0 : index
    %c98 = arith.constant 98 : index
    %246 = vector.load %arg5[%c0_87, %c98] : memref<2x512xf32, #tpu.memory_space<vmem>>, vector<1x256xf32>
    %247 = vector.broadcast %245 : f32 to vector<1x256xf32>
    %248 = arith.mulf %247, %246 : vector<1x256xf32>
    %249 = arith.addf %244, %248 : vector<1x256xf32>
    %c19 = arith.constant 19 : index
    %250 = memref.load %arg1[%c19] : memref<98xf32, #tpu.memory_space<smem>>
    %c0_88 = arith.constant 0 : index
    %c114 = arith.constant 114 : index
    %251 = vector.load %arg5[%c0_88, %c114] : memref<2x512xf32, #tpu.memory_space<vmem>>, vector<1x256xf32>
    %252 = vector.broadcast %250 : f32 to vector<1x256xf32>
    %253 = arith.mulf %252, %251 : vector<1x256xf32>
    %254 = arith.addf %249, %253 : vector<1x256xf32>
    %c26 = arith.constant 26 : index
    %255 = memref.load %arg1[%c26] : memref<98xf32, #tpu.memory_space<smem>>
    %c0_89 = arith.constant 0 : index
    %c130 = arith.constant 130 : index
    %256 = vector.load %arg5[%c0_89, %c130] : memref<2x512xf32, #tpu.memory_space<vmem>>, vector<1x256xf32>
    %257 = vector.broadcast %255 : f32 to vector<1x256xf32>
    %258 = arith.mulf %257, %256 : vector<1x256xf32>
    %259 = arith.addf %254, %258 : vector<1x256xf32>
    %c33 = arith.constant 33 : index
    %260 = memref.load %arg1[%c33] : memref<98xf32, #tpu.memory_space<smem>>
    %c0_90 = arith.constant 0 : index
    %c146 = arith.constant 146 : index
    %261 = vector.load %arg5[%c0_90, %c146] : memref<2x512xf32, #tpu.memory_space<vmem>>, vector<1x256xf32>
    %262 = vector.broadcast %260 : f32 to vector<1x256xf32>
    %263 = arith.mulf %262, %261 : vector<1x256xf32>
    %264 = arith.addf %259, %263 : vector<1x256xf32>
    %c40_91 = arith.constant 40 : index
    %265 = memref.load %arg1[%c40_91] : memref<98xf32, #tpu.memory_space<smem>>
    %c0_92 = arith.constant 0 : index
    %c162 = arith.constant 162 : index
    %266 = vector.load %arg5[%c0_92, %c162] : memref<2x512xf32, #tpu.memory_space<vmem>>, vector<1x256xf32>
    %267 = vector.broadcast %265 : f32 to vector<1x256xf32>
    %268 = arith.mulf %267, %266 : vector<1x256xf32>
    %269 = arith.addf %264, %268 : vector<1x256xf32>
    %c47 = arith.constant 47 : index
    %270 = memref.load %arg1[%c47] : memref<98xf32, #tpu.memory_space<smem>>
    %c0_93 = arith.constant 0 : index
    %c178 = arith.constant 178 : index
    %271 = vector.load %arg5[%c0_93, %c178] : memref<2x512xf32, #tpu.memory_space<vmem>>, vector<1x256xf32>
    %272 = vector.broadcast %270 : f32 to vector<1x256xf32>
    %273 = arith.mulf %272, %271 : vector<1x256xf32>
    %274 = arith.addf %269, %273 : vector<1x256xf32>
    %275 = arith.mulf %238, %274 : vector<1x256xf32>
    %276 = arith.addf %237, %275 : vector<1x256xf32>
    %c6 = arith.constant 6 : index
    %c0_94 = arith.constant 0 : index
    %277 = vector.load %arg3[%c6, %c0_94] : memref<7x256xf32, #tpu.memory_space<vmem>>, vector<1x256xf32>
    %cst_95 = arith.constant 0.000000e+00 : f32
    %278 = vector.broadcast %cst_95 : f32 to vector<1x256xf32>
    %c6_96 = arith.constant 6 : index
    %279 = memref.load %arg1[%c6_96] : memref<98xf32, #tpu.memory_space<smem>>
    %c0_97 = arith.constant 0 : index
    %c83 = arith.constant 83 : index
    %280 = vector.load %arg5[%c0_97, %c83] : memref<2x512xf32, #tpu.memory_space<vmem>>, vector<1x256xf32>
    %281 = vector.broadcast %279 : f32 to vector<1x256xf32>
    %282 = arith.mulf %281, %280 : vector<1x256xf32>
    %283 = arith.addf %278, %282 : vector<1x256xf32>
    %c13 = arith.constant 13 : index
    %284 = memref.load %arg1[%c13] : memref<98xf32, #tpu.memory_space<smem>>
    %c0_98 = arith.constant 0 : index
    %c99 = arith.constant 99 : index
    %285 = vector.load %arg5[%c0_98, %c99] : memref<2x512xf32, #tpu.memory_space<vmem>>, vector<1x256xf32>
    %286 = vector.broadcast %284 : f32 to vector<1x256xf32>
    %287 = arith.mulf %286, %285 : vector<1x256xf32>
    %288 = arith.addf %283, %287 : vector<1x256xf32>
    %c20 = arith.constant 20 : index
    %289 = memref.load %arg1[%c20] : memref<98xf32, #tpu.memory_space<smem>>
    %c0_99 = arith.constant 0 : index
    %c115 = arith.constant 115 : index
    %290 = vector.load %arg5[%c0_99, %c115] : memref<2x512xf32, #tpu.memory_space<vmem>>, vector<1x256xf32>
    %291 = vector.broadcast %289 : f32 to vector<1x256xf32>
    %292 = arith.mulf %291, %290 : vector<1x256xf32>
    %293 = arith.addf %288, %292 : vector<1x256xf32>
    %c27 = arith.constant 27 : index
    %294 = memref.load %arg1[%c27] : memref<98xf32, #tpu.memory_space<smem>>
    %c0_100 = arith.constant 0 : index
    %c131 = arith.constant 131 : index
    %295 = vector.load %arg5[%c0_100, %c131] : memref<2x512xf32, #tpu.memory_space<vmem>>, vector<1x256xf32>
    %296 = vector.broadcast %294 : f32 to vector<1x256xf32>
    %297 = arith.mulf %296, %295 : vector<1x256xf32>
    %298 = arith.addf %293, %297 : vector<1x256xf32>
    %c34 = arith.constant 34 : index
    %299 = memref.load %arg1[%c34] : memref<98xf32, #tpu.memory_space<smem>>
    %c0_101 = arith.constant 0 : index
    %c147 = arith.constant 147 : index
    %300 = vector.load %arg5[%c0_101, %c147] : memref<2x512xf32, #tpu.memory_space<vmem>>, vector<1x256xf32>
    %301 = vector.broadcast %299 : f32 to vector<1x256xf32>
    %302 = arith.mulf %301, %300 : vector<1x256xf32>
    %303 = arith.addf %298, %302 : vector<1x256xf32>
    %c41 = arith.constant 41 : index
    %304 = memref.load %arg1[%c41] : memref<98xf32, #tpu.memory_space<smem>>
    %c0_102 = arith.constant 0 : index
    %c163 = arith.constant 163 : index
    %305 = vector.load %arg5[%c0_102, %c163] : memref<2x512xf32, #tpu.memory_space<vmem>>, vector<1x256xf32>
    %306 = vector.broadcast %304 : f32 to vector<1x256xf32>
    %307 = arith.mulf %306, %305 : vector<1x256xf32>
    %308 = arith.addf %303, %307 : vector<1x256xf32>
    %c48_103 = arith.constant 48 : index
    %309 = memref.load %arg1[%c48_103] : memref<98xf32, #tpu.memory_space<smem>>
    %c0_104 = arith.constant 0 : index
    %c179 = arith.constant 179 : index
    %310 = vector.load %arg5[%c0_104, %c179] : memref<2x512xf32, #tpu.memory_space<vmem>>, vector<1x256xf32>
    %311 = vector.broadcast %309 : f32 to vector<1x256xf32>
    %312 = arith.mulf %311, %310 : vector<1x256xf32>
    %313 = arith.addf %308, %312 : vector<1x256xf32>
    %314 = arith.mulf %277, %313 : vector<1x256xf32>
    %315 = arith.addf %276, %314 : vector<1x256xf32>
    %c0_105 = arith.constant 0 : index
    %c0_106 = arith.constant 0 : index
    %316 = vector.load %arg3[%c0_105, %c0_106] : memref<7x256xf32, #tpu.memory_space<vmem>>, vector<1x256xf32>
    %cst_107 = arith.constant 0.000000e+00 : f32
    %317 = vector.broadcast %cst_107 : f32 to vector<1x256xf32>
    %c49 = arith.constant 49 : index
    %318 = memref.load %arg1[%c49] : memref<98xf32, #tpu.memory_space<smem>>
    %c1_108 = arith.constant 1 : index
    %c77_109 = arith.constant 77 : index
    %319 = vector.load %arg5[%c1_108, %c77_109] : memref<2x512xf32, #tpu.memory_space<vmem>>, vector<1x256xf32>
    %320 = vector.broadcast %318 : f32 to vector<1x256xf32>
    %321 = arith.mulf %320, %319 : vector<1x256xf32>
    %322 = arith.addf %317, %321 : vector<1x256xf32>
    %c56_110 = arith.constant 56 : index
    %323 = memref.load %arg1[%c56_110] : memref<98xf32, #tpu.memory_space<smem>>
    %c1_111 = arith.constant 1 : index
    %c93_112 = arith.constant 93 : index
    %324 = vector.load %arg5[%c1_111, %c93_112] : memref<2x512xf32, #tpu.memory_space<vmem>>, vector<1x256xf32>
    %325 = vector.broadcast %323 : f32 to vector<1x256xf32>
    %326 = arith.mulf %325, %324 : vector<1x256xf32>
    %327 = arith.addf %322, %326 : vector<1x256xf32>
    %c63 = arith.constant 63 : index
    %328 = memref.load %arg1[%c63] : memref<98xf32, #tpu.memory_space<smem>>
    %c1_113 = arith.constant 1 : index
    %c109_114 = arith.constant 109 : index
    %329 = vector.load %arg5[%c1_113, %c109_114] : memref<2x512xf32, #tpu.memory_space<vmem>>, vector<1x256xf32>
    %330 = vector.broadcast %328 : f32 to vector<1x256xf32>
    %331 = arith.mulf %330, %329 : vector<1x256xf32>
    %332 = arith.addf %327, %331 : vector<1x256xf32>
    %c70 = arith.constant 70 : index
    %333 = memref.load %arg1[%c70] : memref<98xf32, #tpu.memory_space<smem>>
    %c1_115 = arith.constant 1 : index
    %c125_116 = arith.constant 125 : index
    %334 = vector.load %arg5[%c1_115, %c125_116] : memref<2x512xf32, #tpu.memory_space<vmem>>, vector<1x256xf32>
    %335 = vector.broadcast %333 : f32 to vector<1x256xf32>
    %336 = arith.mulf %335, %334 : vector<1x256xf32>
    %337 = arith.addf %332, %336 : vector<1x256xf32>
    %c77_117 = arith.constant 77 : index
    %338 = memref.load %arg1[%c77_117] : memref<98xf32, #tpu.memory_space<smem>>
    %c1_118 = arith.constant 1 : index
    %c141_119 = arith.constant 141 : index
    %339 = vector.load %arg5[%c1_118, %c141_119] : memref<2x512xf32, #tpu.memory_space<vmem>>, vector<1x256xf32>
    %340 = vector.broadcast %338 : f32 to vector<1x256xf32>
    %341 = arith.mulf %340, %339 : vector<1x256xf32>
    %342 = arith.addf %337, %341 : vector<1x256xf32>
    %c84 = arith.constant 84 : index
    %343 = memref.load %arg1[%c84] : memref<98xf32, #tpu.memory_space<smem>>
    %c1_120 = arith.constant 1 : index
    %c157_121 = arith.constant 157 : index
    %344 = vector.load %arg5[%c1_120, %c157_121] : memref<2x512xf32, #tpu.memory_space<vmem>>, vector<1x256xf32>
    %345 = vector.broadcast %343 : f32 to vector<1x256xf32>
    %346 = arith.mulf %345, %344 : vector<1x256xf32>
    %347 = arith.addf %342, %346 : vector<1x256xf32>
    %c91 = arith.constant 91 : index
    %348 = memref.load %arg1[%c91] : memref<98xf32, #tpu.memory_space<smem>>
    %c1_122 = arith.constant 1 : index
    %c173_123 = arith.constant 173 : index
    %349 = vector.load %arg5[%c1_122, %c173_123] : memref<2x512xf32, #tpu.memory_space<vmem>>, vector<1x256xf32>
    %350 = vector.broadcast %348 : f32 to vector<1x256xf32>
    %351 = arith.mulf %350, %349 : vector<1x256xf32>
    %352 = arith.addf %347, %351 : vector<1x256xf32>
    %353 = arith.mulf %316, %352 : vector<1x256xf32>
    %354 = arith.addf %315, %353 : vector<1x256xf32>
    %c1_124 = arith.constant 1 : index
    %c0_125 = arith.constant 0 : index
    %355 = vector.load %arg3[%c1_124, %c0_125] : memref<7x256xf32, #tpu.memory_space<vmem>>, vector<1x256xf32>
    %cst_126 = arith.constant 0.000000e+00 : f32
    %356 = vector.broadcast %cst_126 : f32 to vector<1x256xf32>
    %c50 = arith.constant 50 : index
    %357 = memref.load %arg1[%c50] : memref<98xf32, #tpu.memory_space<smem>>
    %c1_127 = arith.constant 1 : index
    %c78_128 = arith.constant 78 : index
    %358 = vector.load %arg5[%c1_127, %c78_128] : memref<2x512xf32, #tpu.memory_space<vmem>>, vector<1x256xf32>
    %359 = vector.broadcast %357 : f32 to vector<1x256xf32>
    %360 = arith.mulf %359, %358 : vector<1x256xf32>
    %361 = arith.addf %356, %360 : vector<1x256xf32>
    %c57 = arith.constant 57 : index
    %362 = memref.load %arg1[%c57] : memref<98xf32, #tpu.memory_space<smem>>
    %c1_129 = arith.constant 1 : index
    %c94_130 = arith.constant 94 : index
    %363 = vector.load %arg5[%c1_129, %c94_130] : memref<2x512xf32, #tpu.memory_space<vmem>>, vector<1x256xf32>
    %364 = vector.broadcast %362 : f32 to vector<1x256xf32>
    %365 = arith.mulf %364, %363 : vector<1x256xf32>
    %366 = arith.addf %361, %365 : vector<1x256xf32>
    %c64 = arith.constant 64 : index
    %367 = memref.load %arg1[%c64] : memref<98xf32, #tpu.memory_space<smem>>
    %c1_131 = arith.constant 1 : index
    %c110_132 = arith.constant 110 : index
    %368 = vector.load %arg5[%c1_131, %c110_132] : memref<2x512xf32, #tpu.memory_space<vmem>>, vector<1x256xf32>
    %369 = vector.broadcast %367 : f32 to vector<1x256xf32>
    %370 = arith.mulf %369, %368 : vector<1x256xf32>
    %371 = arith.addf %366, %370 : vector<1x256xf32>
    %c71 = arith.constant 71 : index
    %372 = memref.load %arg1[%c71] : memref<98xf32, #tpu.memory_space<smem>>
    %c1_133 = arith.constant 1 : index
    %c126_134 = arith.constant 126 : index
    %373 = vector.load %arg5[%c1_133, %c126_134] : memref<2x512xf32, #tpu.memory_space<vmem>>, vector<1x256xf32>
    %374 = vector.broadcast %372 : f32 to vector<1x256xf32>
    %375 = arith.mulf %374, %373 : vector<1x256xf32>
    %376 = arith.addf %371, %375 : vector<1x256xf32>
    %c78_135 = arith.constant 78 : index
    %377 = memref.load %arg1[%c78_135] : memref<98xf32, #tpu.memory_space<smem>>
    %c1_136 = arith.constant 1 : index
    %c142_137 = arith.constant 142 : index
    %378 = vector.load %arg5[%c1_136, %c142_137] : memref<2x512xf32, #tpu.memory_space<vmem>>, vector<1x256xf32>
    %379 = vector.broadcast %377 : f32 to vector<1x256xf32>
    %380 = arith.mulf %379, %378 : vector<1x256xf32>
    %381 = arith.addf %376, %380 : vector<1x256xf32>
    %c85 = arith.constant 85 : index
    %382 = memref.load %arg1[%c85] : memref<98xf32, #tpu.memory_space<smem>>
    %c1_138 = arith.constant 1 : index
    %c158_139 = arith.constant 158 : index
    %383 = vector.load %arg5[%c1_138, %c158_139] : memref<2x512xf32, #tpu.memory_space<vmem>>, vector<1x256xf32>
    %384 = vector.broadcast %382 : f32 to vector<1x256xf32>
    %385 = arith.mulf %384, %383 : vector<1x256xf32>
    %386 = arith.addf %381, %385 : vector<1x256xf32>
    %c92 = arith.constant 92 : index
    %387 = memref.load %arg1[%c92] : memref<98xf32, #tpu.memory_space<smem>>
    %c1_140 = arith.constant 1 : index
    %c174_141 = arith.constant 174 : index
    %388 = vector.load %arg5[%c1_140, %c174_141] : memref<2x512xf32, #tpu.memory_space<vmem>>, vector<1x256xf32>
    %389 = vector.broadcast %387 : f32 to vector<1x256xf32>
    %390 = arith.mulf %389, %388 : vector<1x256xf32>
    %391 = arith.addf %386, %390 : vector<1x256xf32>
    %392 = arith.mulf %355, %391 : vector<1x256xf32>
    %393 = arith.addf %354, %392 : vector<1x256xf32>
    %c2_142 = arith.constant 2 : index
    %c0_143 = arith.constant 0 : index
    %394 = vector.load %arg3[%c2_142, %c0_143] : memref<7x256xf32, #tpu.memory_space<vmem>>, vector<1x256xf32>
    %cst_144 = arith.constant 0.000000e+00 : f32
    %395 = vector.broadcast %cst_144 : f32 to vector<1x256xf32>
    %c51 = arith.constant 51 : index
    %396 = memref.load %arg1[%c51] : memref<98xf32, #tpu.memory_space<smem>>
    %c1_145 = arith.constant 1 : index
    %c79_146 = arith.constant 79 : index
    %397 = vector.load %arg5[%c1_145, %c79_146] : memref<2x512xf32, #tpu.memory_space<vmem>>, vector<1x256xf32>
    %398 = vector.broadcast %396 : f32 to vector<1x256xf32>
    %399 = arith.mulf %398, %397 : vector<1x256xf32>
    %400 = arith.addf %395, %399 : vector<1x256xf32>
    %c58 = arith.constant 58 : index
    %401 = memref.load %arg1[%c58] : memref<98xf32, #tpu.memory_space<smem>>
    %c1_147 = arith.constant 1 : index
    %c95_148 = arith.constant 95 : index
    %402 = vector.load %arg5[%c1_147, %c95_148] : memref<2x512xf32, #tpu.memory_space<vmem>>, vector<1x256xf32>
    %403 = vector.broadcast %401 : f32 to vector<1x256xf32>
    %404 = arith.mulf %403, %402 : vector<1x256xf32>
    %405 = arith.addf %400, %404 : vector<1x256xf32>
    %c65 = arith.constant 65 : index
    %406 = memref.load %arg1[%c65] : memref<98xf32, #tpu.memory_space<smem>>
    %c1_149 = arith.constant 1 : index
    %c111_150 = arith.constant 111 : index
    %407 = vector.load %arg5[%c1_149, %c111_150] : memref<2x512xf32, #tpu.memory_space<vmem>>, vector<1x256xf32>
    %408 = vector.broadcast %406 : f32 to vector<1x256xf32>
    %409 = arith.mulf %408, %407 : vector<1x256xf32>
    %410 = arith.addf %405, %409 : vector<1x256xf32>
    %c72 = arith.constant 72 : index
    %411 = memref.load %arg1[%c72] : memref<98xf32, #tpu.memory_space<smem>>
    %c1_151 = arith.constant 1 : index
    %c127_152 = arith.constant 127 : index
    %412 = vector.load %arg5[%c1_151, %c127_152] : memref<2x512xf32, #tpu.memory_space<vmem>>, vector<1x256xf32>
    %413 = vector.broadcast %411 : f32 to vector<1x256xf32>
    %414 = arith.mulf %413, %412 : vector<1x256xf32>
    %415 = arith.addf %410, %414 : vector<1x256xf32>
    %c79_153 = arith.constant 79 : index
    %416 = memref.load %arg1[%c79_153] : memref<98xf32, #tpu.memory_space<smem>>
    %c1_154 = arith.constant 1 : index
    %c143_155 = arith.constant 143 : index
    %417 = vector.load %arg5[%c1_154, %c143_155] : memref<2x512xf32, #tpu.memory_space<vmem>>, vector<1x256xf32>
    %418 = vector.broadcast %416 : f32 to vector<1x256xf32>
    %419 = arith.mulf %418, %417 : vector<1x256xf32>
    %420 = arith.addf %415, %419 : vector<1x256xf32>
    %c86 = arith.constant 86 : index
    %421 = memref.load %arg1[%c86] : memref<98xf32, #tpu.memory_space<smem>>
    %c1_156 = arith.constant 1 : index
    %c159_157 = arith.constant 159 : index
    %422 = vector.load %arg5[%c1_156, %c159_157] : memref<2x512xf32, #tpu.memory_space<vmem>>, vector<1x256xf32>
    %423 = vector.broadcast %421 : f32 to vector<1x256xf32>
    %424 = arith.mulf %423, %422 : vector<1x256xf32>
    %425 = arith.addf %420, %424 : vector<1x256xf32>
    %c93_158 = arith.constant 93 : index
    %426 = memref.load %arg1[%c93_158] : memref<98xf32, #tpu.memory_space<smem>>
    %c1_159 = arith.constant 1 : index
    %c175_160 = arith.constant 175 : index
    %427 = vector.load %arg5[%c1_159, %c175_160] : memref<2x512xf32, #tpu.memory_space<vmem>>, vector<1x256xf32>
    %428 = vector.broadcast %426 : f32 to vector<1x256xf32>
    %429 = arith.mulf %428, %427 : vector<1x256xf32>
    %430 = arith.addf %425, %429 : vector<1x256xf32>
    %431 = arith.mulf %394, %430 : vector<1x256xf32>
    %432 = arith.addf %393, %431 : vector<1x256xf32>
    %c3_161 = arith.constant 3 : index
    %c0_162 = arith.constant 0 : index
    %433 = vector.load %arg3[%c3_161, %c0_162] : memref<7x256xf32, #tpu.memory_space<vmem>>, vector<1x256xf32>
    %cst_163 = arith.constant 0.000000e+00 : f32
    %434 = vector.broadcast %cst_163 : f32 to vector<1x256xf32>
    %c52 = arith.constant 52 : index
    %435 = memref.load %arg1[%c52] : memref<98xf32, #tpu.memory_space<smem>>
    %c1_164 = arith.constant 1 : index
    %c80_165 = arith.constant 80 : index
    %436 = vector.load %arg5[%c1_164, %c80_165] : memref<2x512xf32, #tpu.memory_space<vmem>>, vector<1x256xf32>
    %437 = vector.broadcast %435 : f32 to vector<1x256xf32>
    %438 = arith.mulf %437, %436 : vector<1x256xf32>
    %439 = arith.addf %434, %438 : vector<1x256xf32>
    %c59 = arith.constant 59 : index
    %440 = memref.load %arg1[%c59] : memref<98xf32, #tpu.memory_space<smem>>
    %c1_166 = arith.constant 1 : index
    %c96_167 = arith.constant 96 : index
    %441 = vector.load %arg5[%c1_166, %c96_167] : memref<2x512xf32, #tpu.memory_space<vmem>>, vector<1x256xf32>
    %442 = vector.broadcast %440 : f32 to vector<1x256xf32>
    %443 = arith.mulf %442, %441 : vector<1x256xf32>
    %444 = arith.addf %439, %443 : vector<1x256xf32>
    %c66 = arith.constant 66 : index
    %445 = memref.load %arg1[%c66] : memref<98xf32, #tpu.memory_space<smem>>
    %c1_168 = arith.constant 1 : index
    %c112_169 = arith.constant 112 : index
    %446 = vector.load %arg5[%c1_168, %c112_169] : memref<2x512xf32, #tpu.memory_space<vmem>>, vector<1x256xf32>
    %447 = vector.broadcast %445 : f32 to vector<1x256xf32>
    %448 = arith.mulf %447, %446 : vector<1x256xf32>
    %449 = arith.addf %444, %448 : vector<1x256xf32>
    %c73 = arith.constant 73 : index
    %450 = memref.load %arg1[%c73] : memref<98xf32, #tpu.memory_space<smem>>
    %c1_170 = arith.constant 1 : index
    %c128_171 = arith.constant 128 : index
    %451 = vector.load %arg5[%c1_170, %c128_171] : memref<2x512xf32, #tpu.memory_space<vmem>>, vector<1x256xf32>
    %452 = vector.broadcast %450 : f32 to vector<1x256xf32>
    %453 = arith.mulf %452, %451 : vector<1x256xf32>
    %454 = arith.addf %449, %453 : vector<1x256xf32>
    %c80_172 = arith.constant 80 : index
    %455 = memref.load %arg1[%c80_172] : memref<98xf32, #tpu.memory_space<smem>>
    %c1_173 = arith.constant 1 : index
    %c144_174 = arith.constant 144 : index
    %456 = vector.load %arg5[%c1_173, %c144_174] : memref<2x512xf32, #tpu.memory_space<vmem>>, vector<1x256xf32>
    %457 = vector.broadcast %455 : f32 to vector<1x256xf32>
    %458 = arith.mulf %457, %456 : vector<1x256xf32>
    %459 = arith.addf %454, %458 : vector<1x256xf32>
    %c87 = arith.constant 87 : index
    %460 = memref.load %arg1[%c87] : memref<98xf32, #tpu.memory_space<smem>>
    %c1_175 = arith.constant 1 : index
    %c160_176 = arith.constant 160 : index
    %461 = vector.load %arg5[%c1_175, %c160_176] : memref<2x512xf32, #tpu.memory_space<vmem>>, vector<1x256xf32>
    %462 = vector.broadcast %460 : f32 to vector<1x256xf32>
    %463 = arith.mulf %462, %461 : vector<1x256xf32>
    %464 = arith.addf %459, %463 : vector<1x256xf32>
    %c94_177 = arith.constant 94 : index
    %465 = memref.load %arg1[%c94_177] : memref<98xf32, #tpu.memory_space<smem>>
    %c1_178 = arith.constant 1 : index
    %c176_179 = arith.constant 176 : index
    %466 = vector.load %arg5[%c1_178, %c176_179] : memref<2x512xf32, #tpu.memory_space<vmem>>, vector<1x256xf32>
    %467 = vector.broadcast %465 : f32 to vector<1x256xf32>
    %468 = arith.mulf %467, %466 : vector<1x256xf32>
    %469 = arith.addf %464, %468 : vector<1x256xf32>
    %470 = arith.mulf %433, %469 : vector<1x256xf32>
    %471 = arith.addf %432, %470 : vector<1x256xf32>
    %c4_180 = arith.constant 4 : index
    %c0_181 = arith.constant 0 : index
    %472 = vector.load %arg3[%c4_180, %c0_181] : memref<7x256xf32, #tpu.memory_space<vmem>>, vector<1x256xf32>
    %cst_182 = arith.constant 0.000000e+00 : f32
    %473 = vector.broadcast %cst_182 : f32 to vector<1x256xf32>
    %c53 = arith.constant 53 : index
    %474 = memref.load %arg1[%c53] : memref<98xf32, #tpu.memory_space<smem>>
    %c1_183 = arith.constant 1 : index
    %c81_184 = arith.constant 81 : index
    %475 = vector.load %arg5[%c1_183, %c81_184] : memref<2x512xf32, #tpu.memory_space<vmem>>, vector<1x256xf32>
    %476 = vector.broadcast %474 : f32 to vector<1x256xf32>
    %477 = arith.mulf %476, %475 : vector<1x256xf32>
    %478 = arith.addf %473, %477 : vector<1x256xf32>
    %c60 = arith.constant 60 : index
    %479 = memref.load %arg1[%c60] : memref<98xf32, #tpu.memory_space<smem>>
    %c1_185 = arith.constant 1 : index
    %c97_186 = arith.constant 97 : index
    %480 = vector.load %arg5[%c1_185, %c97_186] : memref<2x512xf32, #tpu.memory_space<vmem>>, vector<1x256xf32>
    %481 = vector.broadcast %479 : f32 to vector<1x256xf32>
    %482 = arith.mulf %481, %480 : vector<1x256xf32>
    %483 = arith.addf %478, %482 : vector<1x256xf32>
    %c67 = arith.constant 67 : index
    %484 = memref.load %arg1[%c67] : memref<98xf32, #tpu.memory_space<smem>>
    %c1_187 = arith.constant 1 : index
    %c113_188 = arith.constant 113 : index
    %485 = vector.load %arg5[%c1_187, %c113_188] : memref<2x512xf32, #tpu.memory_space<vmem>>, vector<1x256xf32>
    %486 = vector.broadcast %484 : f32 to vector<1x256xf32>
    %487 = arith.mulf %486, %485 : vector<1x256xf32>
    %488 = arith.addf %483, %487 : vector<1x256xf32>
    %c74 = arith.constant 74 : index
    %489 = memref.load %arg1[%c74] : memref<98xf32, #tpu.memory_space<smem>>
    %c1_189 = arith.constant 1 : index
    %c129_190 = arith.constant 129 : index
    %490 = vector.load %arg5[%c1_189, %c129_190] : memref<2x512xf32, #tpu.memory_space<vmem>>, vector<1x256xf32>
    %491 = vector.broadcast %489 : f32 to vector<1x256xf32>
    %492 = arith.mulf %491, %490 : vector<1x256xf32>
    %493 = arith.addf %488, %492 : vector<1x256xf32>
    %c81_191 = arith.constant 81 : index
    %494 = memref.load %arg1[%c81_191] : memref<98xf32, #tpu.memory_space<smem>>
    %c1_192 = arith.constant 1 : index
    %c145_193 = arith.constant 145 : index
    %495 = vector.load %arg5[%c1_192, %c145_193] : memref<2x512xf32, #tpu.memory_space<vmem>>, vector<1x256xf32>
    %496 = vector.broadcast %494 : f32 to vector<1x256xf32>
    %497 = arith.mulf %496, %495 : vector<1x256xf32>
    %498 = arith.addf %493, %497 : vector<1x256xf32>
    %c88 = arith.constant 88 : index
    %499 = memref.load %arg1[%c88] : memref<98xf32, #tpu.memory_space<smem>>
    %c1_194 = arith.constant 1 : index
    %c161_195 = arith.constant 161 : index
    %500 = vector.load %arg5[%c1_194, %c161_195] : memref<2x512xf32, #tpu.memory_space<vmem>>, vector<1x256xf32>
    %501 = vector.broadcast %499 : f32 to vector<1x256xf32>
    %502 = arith.mulf %501, %500 : vector<1x256xf32>
    %503 = arith.addf %498, %502 : vector<1x256xf32>
    %c95_196 = arith.constant 95 : index
    %504 = memref.load %arg1[%c95_196] : memref<98xf32, #tpu.memory_space<smem>>
    %c1_197 = arith.constant 1 : index
    %c177_198 = arith.constant 177 : index
    %505 = vector.load %arg5[%c1_197, %c177_198] : memref<2x512xf32, #tpu.memory_space<vmem>>, vector<1x256xf32>
    %506 = vector.broadcast %504 : f32 to vector<1x256xf32>
    %507 = arith.mulf %506, %505 : vector<1x256xf32>
    %508 = arith.addf %503, %507 : vector<1x256xf32>
    %509 = arith.mulf %472, %508 : vector<1x256xf32>
    %510 = arith.addf %471, %509 : vector<1x256xf32>
    %c5_199 = arith.constant 5 : index
    %c0_200 = arith.constant 0 : index
    %511 = vector.load %arg3[%c5_199, %c0_200] : memref<7x256xf32, #tpu.memory_space<vmem>>, vector<1x256xf32>
    %cst_201 = arith.constant 0.000000e+00 : f32
    %512 = vector.broadcast %cst_201 : f32 to vector<1x256xf32>
    %c54 = arith.constant 54 : index
    %513 = memref.load %arg1[%c54] : memref<98xf32, #tpu.memory_space<smem>>
    %c1_202 = arith.constant 1 : index
    %c82_203 = arith.constant 82 : index
    %514 = vector.load %arg5[%c1_202, %c82_203] : memref<2x512xf32, #tpu.memory_space<vmem>>, vector<1x256xf32>
    %515 = vector.broadcast %513 : f32 to vector<1x256xf32>
    %516 = arith.mulf %515, %514 : vector<1x256xf32>
    %517 = arith.addf %512, %516 : vector<1x256xf32>
    %c61 = arith.constant 61 : index
    %518 = memref.load %arg1[%c61] : memref<98xf32, #tpu.memory_space<smem>>
    %c1_204 = arith.constant 1 : index
    %c98_205 = arith.constant 98 : index
    %519 = vector.load %arg5[%c1_204, %c98_205] : memref<2x512xf32, #tpu.memory_space<vmem>>, vector<1x256xf32>
    %520 = vector.broadcast %518 : f32 to vector<1x256xf32>
    %521 = arith.mulf %520, %519 : vector<1x256xf32>
    %522 = arith.addf %517, %521 : vector<1x256xf32>
    %c68 = arith.constant 68 : index
    %523 = memref.load %arg1[%c68] : memref<98xf32, #tpu.memory_space<smem>>
    %c1_206 = arith.constant 1 : index
    %c114_207 = arith.constant 114 : index
    %524 = vector.load %arg5[%c1_206, %c114_207] : memref<2x512xf32, #tpu.memory_space<vmem>>, vector<1x256xf32>
    %525 = vector.broadcast %523 : f32 to vector<1x256xf32>
    %526 = arith.mulf %525, %524 : vector<1x256xf32>
    %527 = arith.addf %522, %526 : vector<1x256xf32>
    %c75 = arith.constant 75 : index
    %528 = memref.load %arg1[%c75] : memref<98xf32, #tpu.memory_space<smem>>
    %c1_208 = arith.constant 1 : index
    %c130_209 = arith.constant 130 : index
    %529 = vector.load %arg5[%c1_208, %c130_209] : memref<2x512xf32, #tpu.memory_space<vmem>>, vector<1x256xf32>
    %530 = vector.broadcast %528 : f32 to vector<1x256xf32>
    %531 = arith.mulf %530, %529 : vector<1x256xf32>
    %532 = arith.addf %527, %531 : vector<1x256xf32>
    %c82_210 = arith.constant 82 : index
    %533 = memref.load %arg1[%c82_210] : memref<98xf32, #tpu.memory_space<smem>>
    %c1_211 = arith.constant 1 : index
    %c146_212 = arith.constant 146 : index
    %534 = vector.load %arg5[%c1_211, %c146_212] : memref<2x512xf32, #tpu.memory_space<vmem>>, vector<1x256xf32>
    %535 = vector.broadcast %533 : f32 to vector<1x256xf32>
    %536 = arith.mulf %535, %534 : vector<1x256xf32>
    %537 = arith.addf %532, %536 : vector<1x256xf32>
    %c89 = arith.constant 89 : index
    %538 = memref.load %arg1[%c89] : memref<98xf32, #tpu.memory_space<smem>>
    %c1_213 = arith.constant 1 : index
    %c162_214 = arith.constant 162 : index
    %539 = vector.load %arg5[%c1_213, %c162_214] : memref<2x512xf32, #tpu.memory_space<vmem>>, vector<1x256xf32>
    %540 = vector.broadcast %538 : f32 to vector<1x256xf32>
    %541 = arith.mulf %540, %539 : vector<1x256xf32>
    %542 = arith.addf %537, %541 : vector<1x256xf32>
    %c96_215 = arith.constant 96 : index
    %543 = memref.load %arg1[%c96_215] : memref<98xf32, #tpu.memory_space<smem>>
    %c1_216 = arith.constant 1 : index
    %c178_217 = arith.constant 178 : index
    %544 = vector.load %arg5[%c1_216, %c178_217] : memref<2x512xf32, #tpu.memory_space<vmem>>, vector<1x256xf32>
    %545 = vector.broadcast %543 : f32 to vector<1x256xf32>
    %546 = arith.mulf %545, %544 : vector<1x256xf32>
    %547 = arith.addf %542, %546 : vector<1x256xf32>
    %548 = arith.mulf %511, %547 : vector<1x256xf32>
    %549 = arith.addf %510, %548 : vector<1x256xf32>
    %c6_218 = arith.constant 6 : index
    %c0_219 = arith.constant 0 : index
    %550 = vector.load %arg3[%c6_218, %c0_219] : memref<7x256xf32, #tpu.memory_space<vmem>>, vector<1x256xf32>
    %cst_220 = arith.constant 0.000000e+00 : f32
    %551 = vector.broadcast %cst_220 : f32 to vector<1x256xf32>
    %c55 = arith.constant 55 : index
    %552 = memref.load %arg1[%c55] : memref<98xf32, #tpu.memory_space<smem>>
    %c1_221 = arith.constant 1 : index
    %c83_222 = arith.constant 83 : index
    %553 = vector.load %arg5[%c1_221, %c83_222] : memref<2x512xf32, #tpu.memory_space<vmem>>, vector<1x256xf32>
    %554 = vector.broadcast %552 : f32 to vector<1x256xf32>
    %555 = arith.mulf %554, %553 : vector<1x256xf32>
    %556 = arith.addf %551, %555 : vector<1x256xf32>
    %c62 = arith.constant 62 : index
    %557 = memref.load %arg1[%c62] : memref<98xf32, #tpu.memory_space<smem>>
    %c1_223 = arith.constant 1 : index
    %c99_224 = arith.constant 99 : index
    %558 = vector.load %arg5[%c1_223, %c99_224] : memref<2x512xf32, #tpu.memory_space<vmem>>, vector<1x256xf32>
    %559 = vector.broadcast %557 : f32 to vector<1x256xf32>
    %560 = arith.mulf %559, %558 : vector<1x256xf32>
    %561 = arith.addf %556, %560 : vector<1x256xf32>
    %c69 = arith.constant 69 : index
    %562 = memref.load %arg1[%c69] : memref<98xf32, #tpu.memory_space<smem>>
    %c1_225 = arith.constant 1 : index
    %c115_226 = arith.constant 115 : index
    %563 = vector.load %arg5[%c1_225, %c115_226] : memref<2x512xf32, #tpu.memory_space<vmem>>, vector<1x256xf32>
    %564 = vector.broadcast %562 : f32 to vector<1x256xf32>
    %565 = arith.mulf %564, %563 : vector<1x256xf32>
    %566 = arith.addf %561, %565 : vector<1x256xf32>
    %c76 = arith.constant 76 : index
    %567 = memref.load %arg1[%c76] : memref<98xf32, #tpu.memory_space<smem>>
    %c1_227 = arith.constant 1 : index
    %c131_228 = arith.constant 131 : index
    %568 = vector.load %arg5[%c1_227, %c131_228] : memref<2x512xf32, #tpu.memory_space<vmem>>, vector<1x256xf32>
    %569 = vector.broadcast %567 : f32 to vector<1x256xf32>
    %570 = arith.mulf %569, %568 : vector<1x256xf32>
    %571 = arith.addf %566, %570 : vector<1x256xf32>
    %c83_229 = arith.constant 83 : index
    %572 = memref.load %arg1[%c83_229] : memref<98xf32, #tpu.memory_space<smem>>
    %c1_230 = arith.constant 1 : index
    %c147_231 = arith.constant 147 : index
    %573 = vector.load %arg5[%c1_230, %c147_231] : memref<2x512xf32, #tpu.memory_space<vmem>>, vector<1x256xf32>
    %574 = vector.broadcast %572 : f32 to vector<1x256xf32>
    %575 = arith.mulf %574, %573 : vector<1x256xf32>
    %576 = arith.addf %571, %575 : vector<1x256xf32>
    %c90 = arith.constant 90 : index
    %577 = memref.load %arg1[%c90] : memref<98xf32, #tpu.memory_space<smem>>
    %c1_232 = arith.constant 1 : index
    %c163_233 = arith.constant 163 : index
    %578 = vector.load %arg5[%c1_232, %c163_233] : memref<2x512xf32, #tpu.memory_space<vmem>>, vector<1x256xf32>
    %579 = vector.broadcast %577 : f32 to vector<1x256xf32>
    %580 = arith.mulf %579, %578 : vector<1x256xf32>
    %581 = arith.addf %576, %580 : vector<1x256xf32>
    %c97_234 = arith.constant 97 : index
    %582 = memref.load %arg1[%c97_234] : memref<98xf32, #tpu.memory_space<smem>>
    %c1_235 = arith.constant 1 : index
    %c179_236 = arith.constant 179 : index
    %583 = vector.load %arg5[%c1_235, %c179_236] : memref<2x512xf32, #tpu.memory_space<vmem>>, vector<1x256xf32>
    %584 = vector.broadcast %582 : f32 to vector<1x256xf32>
    %585 = arith.mulf %584, %583 : vector<1x256xf32>
    %586 = arith.addf %581, %585 : vector<1x256xf32>
    %587 = arith.mulf %550, %586 : vector<1x256xf32>
    %588 = arith.addf %549, %587 : vector<1x256xf32>
    %589 = arith.negf %588 : vector<1x256xf32>
    %590 = math.exp %589 : vector<1x256xf32>
    %cst_237 = arith.constant 1.000000e+00 : f32
    %591 = vector.broadcast %cst_237 : f32 to vector<1x256xf32>
    %592 = arith.addf %591, %590 : vector<1x256xf32>
    %593 = arith.divf %591, %592 : vector<1x256xf32>
    %c0_238 = arith.constant 0 : index
    %c0_239 = arith.constant 0 : index
    %c0_240 = arith.constant 0 : index
    %594 = vector.load %arg4[%c0_238, %c0_239, %c0_240] : memref<1x1x256xf32, #tpu.memory_space<vmem>>, vector<1x1x256xf32>
    %595 = vector.shape_cast %594 : vector<1x1x256xf32> to vector<1x256xf32>
    %596 = vector.shape_cast %593 : vector<1x256xf32> to vector<1x1x256xf32>
    tpu.vector_store %arg4[%c0_238, %c0_239, %c0_240], %596 {strides = array<i32>} : memref<1x1x256xf32, #tpu.memory_space<vmem>>, vector<1x1x256xf32>,
    return
  }
  func.func @transform_0(%arg0: i32, %arg1: memref<98xf32, #tpu.memory_space<smem>>) -> (i32, i32, i32) {
    %c0_i32 = arith.constant 0 : i32
    %c0_i32_0 = arith.constant 0 : i32
    %c0_i32_1 = arith.constant 0 : i32
    return %arg0, %c0_i32, %c0_i32_0 : i32, i32, i32
  }
  func.func @transform_1(%arg0: i32, %arg1: memref<98xf32, #tpu.memory_space<smem>>) -> (i32, i32) {
    %c0_i32 = arith.constant 0 : i32
    %c0_i32_0 = arith.constant 0 : i32
    %c0_i32_1 = arith.constant 0 : i32
    return %c0_i32, %c0_i32_0 : i32, i32
  }
  func.func @transform_2(%arg0: i32, %arg1: memref<98xf32, #tpu.memory_space<smem>>) -> (i32, i32, i32) {
    %c0_i32 = arith.constant 0 : i32
    %c0_i32_0 = arith.constant 0 : i32
    %c0_i32_1 = arith.constant 0 : i32
    return %arg0, %c0_i32, %c0_i32_0 : i32, i32, i32
  }
}

</mosaic_0001>

<bundles_post_ra>
// kernel: tpu_custom_call.1
= control target key start
LH: loop header
LB: loop body
LE: loop exit
PB: predicated region body
PF: predicated region fallthrough
CT: control target
= control target key end

     0   :  { %s1775_s15 = smov [#allocation4]   ;;  %s2566_s0 = inlined_call_operand.hbm [shape: f32[98], index: 0, kind: input, shape index: {}]   ;;  %s2567_s1 = inlined_call_operand.hbm [shape: f32[2,64,256], index: 1, kind: input, shape index: {}]   ;;  %s2568_s2 = inlined_call_operand.hbm [shape: f32[7,256], index: 2, kind: input, shape index: {}]   ;;  %s2569_s3 = inlined_call_operand.hbm [shape: f32[2,1,256], index: 3, kind: output, shape index: {}]  }
   0x1   :  { %s9_s14 = sshll.u32 %s2566_s0, 4  ;;  %s10_s14 = int_to_ptr.hbm [resolvable:$true] %s9_s14 }
   0x2   :  { %12 = dma.hbm_to_smem %s10_s14, 16, %s1775_s15, [#allocation3] }
   0x3   :  { %1745 = dma.done.wait [#allocation3], 16 }
   0x4   :  { %1746 = vsyncadd [#allocation3], 4294967280 }
   0x5   :  { %15 = sfence }
   0x6   :  { %16 = vsyncpa [#allocation6], 0 }
   0x7   :  { %18 = vsyncpa [#allocation6 + $0x1], 0 }
   0x8   :  { %19 = vsyncpa [#allocation9], 0 }
   0x9   :  { %20 = vsyncpa [#allocation7], 0 }
   0xa   :  { %22 = vsyncpa [#allocation7 + $0x1], 0  ;;  %s1815_s16 = smov 0   ;;  %s1817_s17 = smov 0  }
   0xb   :  { %s1819_s18 = smov 0   ;;  %s1821_s19 = smov 0  }
   0xc LB: > { %s1836_s0 = sadd.s32 4294967295, %s1773_s19   ;;  %s1437_s20 = sadd.s32 4294967294, %s1773_s19   ;;  %s1773_s19 = sphi %s1821_s19, %s2586_s19   ;;  %s1769_s18 = sphi %s1819_s18, %s2585_s18   ;;  %s1765_s17 = sphi %s1817_s17, %s2584_s17   ;;  %s1761_s16 = sphi %s1815_s16, %s2583_s16  }
   0xd   : > { %s1840_s21 = sadd.s32 1, %s1773_s19   ;;  %s35_s22 = sadd.s32 1, %s1769_s18 }
   0xe   : > { %s32_s23 = ssub.s32 %s1773_s19, %s1840_s21  ;;  %p42_p0 = scmp.ne.s32.totalorder %s1769_s18, %s1765_s17 }
   0xf   : > { %p33_p1 = scmp.eq.s32.totalorder %s32_s23, 0  ;;  %p43_p2 = scmp.eq.s32.totalorder %s1773_s19, 0 }
  0x10   : > { %p48_p3 = scmp.ne.s32.totalorder %s1765_s17, %s1761_s16  ;;  %p49_p4 = scmp.eq.s32.totalorder %s1836_s0, 0 }
  0x11   : > { %s1852_s24 = scalar_select %p33_p1, %s1769_s18, %s35_s22  }
  0x12   : > { %p1854_p5 = por %p43_p2, %p42_p0  ;;  %p1860_p6 = por %p49_p4, %p48_p3 }
  0x13   : > { %p93_p7 = scmp.eq.s32.totalorder %s1836_s0, 1  ;;  %p99_p8 = scmp.eq.s32.totalorder %s1437_s20, 1 }
  0x14   : > { %p1438_p9 = scmp.ge.s32.totalorder %s1773_s19, 1  ;;  %p106_p10 = scmp.lt.s32.totalorder %s1773_s19, 3 }
  0x15   : > { %p1867_p11 = por %p93_p7, %p42_p0  ;;  %p1871_p12 = por %p99_p8, %p48_p3 }
  0x16   : > { %p1875_p13 = pnand %p1438_p9, %p106_p10  ;;  %s118_s5 = sshll.u32 %s2568_s2, 4  ;;  %s119_s5 = int_to_ptr.hbm [resolvable:$true] %s118_s5 }
  0x17   : > { %s1776_s6 = smov [#allocation8]   ;;  %p1572_p3 = scmp.lt.s32.totalorder %s1773_s19, 2 }
  0x18   : > { %p1559_p1 = pneg %p1875_p13  ;;  %s120_s7 = sshll.u32 %s1776_s6, 4  ;;  %s121_s7 = int_to_ptr.vmem [resolvable:$true] %s120_s7 }
  0x19   : > { %s131_s8 = sand.u32 1, %s1769_s18   ;;  %p1891_p7 = pnand %p1572_p3, %p1854_p5 }
  0x1a   : > { %p1560_p2 = pnand %p1559_p1, %p49_p4  ;;  %s1441_s10 = sshll.u32 %s131_s8, 7 }
  0x1b   : > { %s1550_s11 = sshll.u32 %s1773_s19, 7  ;;  %s135_s20 = scalar_lea.vmem [#allocation5], %s1441_s10 }
  0x1c   : > { %1562 = dma.hbm_to_vmem [thread:$0]  (!%p1560_p2), %s119_s5, 256, %s121_s7, [#allocation9]  }
  0x1d   : > { %s140_s14 = scalar_lea.hbm %s2567_s1, %s1550_s11  ;;  %s143_s22 = sshll.u32 %s135_s20, 4  ;;  %s144_s22 = int_to_ptr.vmem [resolvable:$true] %s143_s22 }
  0x1e   : > { %s141_s15 = sshll.u32 %s140_s14, 4  ;;  %s132_s23 = scalar_lea.sflag [#allocation6], %s131_s8  ;;  %s142_s15 = int_to_ptr.hbm [resolvable:$true] %s141_s15 }
  0x1f   : > { %s1671_s30 = sshra.s32 %s142_s15, 4  ;;  %p1675_p8 = pneg %p1891_p7  ;;  %s1672_s30 = int_to_ptr.hbm [resolvable:$true] %s1671_s30 }
  0x20   : > { %s1673_s25 = scalar_lea.hbm %s1672_s30, 128  ;;  %s1678_s6 = scalar_lea.hbm %s2567_s1, 256 }
  0x21   : > { %p1674_p5 = scmp.ne.s32.totalorder %s1672_s30, %s1673_s25  ;;  %p1679_p1 = scmp.lt.s32.totalorder %s1672_s30, %s2567_s1 }
  0x22   : > { %p1680_p2 = scmp.lt.s32.totalorder %s1678_s6, %s1673_s25 }
  0x23   : > { %p1676_p9 = pnand %p1675_p8, %p1674_p5 }
  0x24   : > { %p1681_p3 = por %p1680_p2, %p1679_p1 }
  0x25   : > { %p1677_p10 = pneg %p1676_p9 }
  0x27   : > { %p1682_p0 = pnand %p1681_p3, %p1677_p10 }
  0x29   : > { %1685 = shalt.err (!%p1682_p0)
}
  0x2a   : > { %s1777_s8 = smov 256   ;;  %s1778_s10 = smov 16  }
  0x2b   : > { %1566 = dma.hbm_to_vmem [thread:$0]  (!%p1891_p7), %s142_s15, 2048, %s144_s22, %s132_s23, %s1777_s8, %s1777_s8, %s1778_s10  }
  0x2c   : > { %155 = sbr.rel (%p1875_p13) target bundleno = 661 (0x295), region = 28  ;;  %s1912_s12 = sand.u32 (!%p1875_p13), 1, %s1765_s17  }
  0x2d   : > { %s1445_s13 = sshll.u32 (!%p1875_p13), %s1912_s12, 7  ;;  %s158_s14 = scalar_lea.sflag (!%p1875_p13), [#allocation6], %s1912_s12 }
  0x2e   : > { %s1916_s20 = scalar_lea.vmem (!%p1875_p13), [#allocation5], %s1445_s13 }
  0x31   : > { %1748 = dma.done.wait (%p1860_p6), %s158_s14, 2048  }
  0x32   : > { %1750 = vsyncadd (%p1860_p6), %s158_s14, 4294965248 }
  0x33   : > { %1752 = dma.done.wait (%p49_p4), [#allocation9], 256  }
  0x34   : > { %1754 = vsyncadd (%p49_p4), [#allocation9], 4294967040  ;;  %v1779_v0 = vmov 0.0   ;;  %v1927_v1 = vld [vmem:[%s1916_s20] sm:$0xff]  ;;  %v1930_v2 = vld [vmem:[%s1916_s20 + $0x8] sm:$0xff]  ;;  %v266_v43 = vlaneseq  ;;  %s1452_s26 = sld [smem:[#allocation4 + $0x23]] }
  0x35   : > { %259 = vst [vmem:[#allocation2 + $0x6] sm:$0x3] %v1779_v0  ;;  %v1933_v3 = vld [vmem:[%s1916_s20 + $0x10] sm:$0xff]  ;;  %v1936_v4 = vld [vmem:[%s1916_s20 + $0x18] sm:$0xff]  ;;  %v1941_v6 = vld [vmem:[%s1916_s20 + $0x20] sm:$0xff]  ;;  %vm263_vm0 = vcmask 1040384  }
  0x36   : > { %258 = vst [vmem:[#allocation2] sm:$0x3] %v1779_v0  ;;  %v192_v5 = vadd.f32 %v1933_v3, %v1927_v1  ;;  %v1944_v7 = vld [vmem:[%s1916_s20 + $0x28] sm:$0xff]  ;;  %v193_v8 = vadd.f32 %v1936_v4, %v1930_v2  ;;  %v1949_v9 = vld [vmem:[%s1916_s20 + $0x30] sm:$0xff]  ;;  %v1953_v11 = vld [vmem:[%s1916_s20 + $0x38] sm:$0xff]  ;;  %s1450_s29 = sld [smem:[#allocation4 + $0x15]] }
  0x37   : > { %v1957_v13 = vld [vmem:[%s1916_s20 + $0x40] sm:$0xff]  ;;  %v1961_v15 = vld [vmem:[%s1916_s20 + $0x48] sm:$0xff]  ;;  %v1965_v17 = vld [vmem:[%s1916_s20 + $0x50] sm:$0xff]  ;;  %vm1990_vm1 = vcmp.lt.s32.totalorder %v266_v43, 256  ;;  %s1448_s9 = sld [smem:[#allocation4 + $0x7]]  ;;  %s1780_s30 = smov 48   ;;  %v195_v43 = vmax.f32 %v1930_v2, %v1936_v4 }
  0x38   : > { %v198_v10 = vadd.f32 %v1941_v6, %v192_v5  ;;  %v199_v12 = vadd.f32 %v1944_v7, %v193_v8  ;;  %v1969_v19 = vld [vmem:[%s1916_s20 + $0x58] sm:$0xff]  ;;  %v1973_v21 = vld [vmem:[%s1916_s20 + $0x60] sm:$0xff]  ;;  %v1977_v23 = vld [vmem:[%s1916_s20 + $0x68] sm:$0xff]  ;;  %s1453_s15 = sld [smem:[#allocation4 + $0x2a]]  ;;  %s1781_s25 = smov 80   ;;  %vm292_vm2 = vcmask 916480  }
  0x39   : > { %v1981_v25 = vld [vmem:[%s1916_s20 + $0x70] sm:$0xff]  ;;  %v1985_v27 = vld [vmem:[%s1916_s20 + $0x78] sm:$0xff]  ;;  %s1451_s22 = sld [smem:[#allocation4 + $0x1c]]  ;;  %s1782_s5 = smov 112   ;;  %vm303_vm3 = vcmask 785408   ;;  %vm314_vm4 = vcmask 654336  }
  0x3a   : > { %v204_v14 = vadd.f32 %v1949_v9, %v198_v10  ;;  %v205_v16 = vadd.f32 %v1953_v11, %v199_v12  ;;  %s1449_s23 = sld [smem:[#allocation4 + $0xe]]  ;;  %v332_v49 = vstv %s1452_s26  ;;  %s1783_s11 = smov 32   ;;  %vm327_vm5 = vcmask 523264  }
  0x3b   : > { %s1456_s4 = sld [smem:[#allocation4 + $0xf]]  ;;  %s1784_s8 = smov 64   ;;  %vm338_vm6 = vcmask 392192   ;;  %vm349_vm7 = vcmask 261120   ;;  %vm357_vm8 = vcmask 416768   ;;  %vm507_vm9 = vcmask 400384  }
  0x3c   : > { %v210_v18 = vadd.f32 %v1957_v13, %v204_v14  ;;  %v211_v20 = vadd.f32 %v1961_v15, %v205_v16  ;;  %v308_v50 = vstv %s1450_s29  ;;  %s1455_s6 = sld [smem:[#allocation4 + $0x8]]  ;;  %s1785_s13 = smov 96   ;;  %vm432_vm10 = vcmask 408576  }
  0x3d   : > { %v286_v51 = vstv %s1448_s9  ;;  %s1457_s7 = sld [smem:[#allocation4 + $0x16]]  ;;  %vm732_vm11 = vcmask 375808   ;;  %vm657_vm12 = vcmask 384000   ;;  %vm807_vm13 = vcmask 367616  }
  0x3e   : > { %v216_v22 = vadd.f32 %v1965_v17, %v210_v18  ;;  %v217_v24 = vadd.f32 %v1969_v19, %v211_v20  ;;  %v343_v57 = vstv %s1453_s15  ;;  %s1459_s10 = sld [smem:[#allocation4 + $0x24]] }
  0x3f   : > { %v321_v58 = vstv %s1451_s22  ;;  %s1458_s14 = sld [smem:[#allocation4 + $0x1d]] }
  0x40   : > { %v222_v26 = vadd.f32 %v1973_v21, %v216_v22  ;;  %v223_v28 = vadd.f32 %v1977_v23, %v217_v24  ;;  %v297_v59 = vstv %s1449_s23  ;;  %s1460_s20 = sld [smem:[#allocation4 + $0x2b]] }
  0x41   : > { %v379_v63 = vstv %s1456_s4  ;;  %s1462_s26 = sld [smem:[#allocation4 + $0x9]] }
  0x42   : > { %v228_v29 = vadd.f32 %v1981_v25, %v222_v26  ;;  %v229_v30 = vadd.f32 %v1985_v27, %v223_v28  ;;  %v369_v0 = vstv %s1455_s6  ;;  %s1464_s29 = sld [smem:[#allocation4 + $0x17]] }
  0x43   : > { %v389_v5 = vstv %s1457_s7  ;;  %s1463_s9 = sld [smem:[#allocation4 + $0x10]] }
  0x44   : > { %v232_v31 = vrot.slane %v228_v29, 4  ;;  %v238_v32 = vrot.slane %v229_v30, 4  ;;  %v409_v14 = vstv %s1459_s10  ;;  %s1465_s15 = sld [smem:[#allocation4 + $0x1e]] }
  0x45   : > { %v399_v16 = vstv %s1458_s14  ;;  %s1467_s22 = sld [smem:[#allocation4 + $0x2c]] }
  0x46   : > { %v233_v33 = vadd.f32 %v232_v31, %v228_v29  ;;  %v239_v34 = vadd.f32 %v238_v32, %v229_v30  ;;  %v419_v18 = vstv %s1460_s20  ;;  %s1466_s23 = sld [smem:[#allocation4 + $0x25]] }
  0x47   : > { %v444_v26 = vstv %s1462_s26  ;;  %s1471_s4 = sld [smem:[#allocation4 + $0x18]] }
  0x48   : > { %v234_v35 = vrot.slane %v233_v33, 2  ;;  %v240_v36 = vrot.slane %v239_v34, 2  ;;  %v464_v28 = vstv %s1464_s29  ;;  %s1470_s6 = sld [smem:[#allocation4 + $0x11]] }
  0x49   : > { %v454_v29 = vstv %s1463_s9  ;;  %s1469_s7 = sld [smem:[#allocation4 + $0xa]] }
  0x4a   : > { %v235_v37 = vadd.f32 %v234_v35, %v233_v33  ;;  %v241_v38 = vadd.f32 %v240_v36, %v239_v34  ;;  %v474_v33 = vstv %s1465_s15  ;;  %s1474_s10 = sld [smem:[#allocation4 + $0x2d]] }
  0x4b   : > { %v494_v34 = vstv %s1467_s22  ;;  %s1473_s14 = sld [smem:[#allocation4 + $0x26]] }
  0x4c   : > { %v236_v39 = vrot.slane %v235_v37, 1  ;;  %v242_v40 = vrot.slane %v241_v38, 1  ;;  %v484_v35 = vstv %s1466_s23  ;;  %s1472_s20 = sld [smem:[#allocation4 + $0x1f]] }
  0x4d   : > { %s2048_s26 = sld [smem:[#allocation4 + $0x12]] }
  0x4e   : > { %v237_v41 = vadd.f32 %v236_v39, %v235_v37  ;;  %v243_v42 = vadd.f32 %v242_v40, %v241_v38  ;;  %v540_v40 = vstv %s1471_s4  ;;  %s1476_s29 = sld [smem:[#allocation4 + $0xb]] }
  0x4f   : > { %s1478_s9 = sld [smem:[#allocation4 + $0x19]] }
  0x50   : > { %v256_v44 = vmul.f32 0.015625, %v237_v41  ;;  %v257_v45 = vmul.f32 0.015625, %v243_v42  ;;  %v529_v41 = vstv %s1470_s6  ;;  %v519_v42 = vstv %s1469_s7  ;;  %s2064_s15 = sld [smem:[#allocation4 + $0x27]] }
  0x51   : > { %s1479_s22 = sld [smem:[#allocation4 + $0x20]] }
  0x52   : > { %v262_v46 = vrot.slane %v257_v45, 7  ;;  %s1481_s23 = sld [smem:[#allocation4 + $0x2e]] }
  0x53   : > { %s1483_s4 = sld [smem:[#allocation4 + $0xc]] }
  0x54   : > { %v264_v48 = vsel %vm263_vm0, %v256_v44, %v262_v46  ;;  %v194_v46 = vmax.f32 %v1927_v1, %v1933_v3  ;;  %v570_v1 = vstv %s1474_s10  ;;  %v560_v3 = vstv %s1473_s14  ;;  %s1485_s6 = sld [smem:[#allocation4 + $0x1a]] }
  0x55   : > { %271 = vst.msk [vmem:[#allocation2 + $0x2] ss:$2 sm:$0x3] %vm1990_vm1, %v264_v48  ;;  %v201_v48 = vmax.f32 %v195_v43, %v1944_v7  ;;  %v550_v7 = vstv %s1472_s20  ;;  %s1484_s7 = sld [smem:[#allocation4 + $0x13]] }
  0x56   : > { %s1486_s10 = sld [smem:[#allocation4 + $0x21]] }
  0x57   : > { %s1488_s14 = sld [smem:[#allocation4 + $0x2f]] }
  0x58   : > { %s1487_s20 = sld [smem:[#allocation4 + $0x28]] }
  0x5c   : > { %v1997_v52 = vld [vmem:[#allocation2 + $0x2] ss:$2 sm:$0x7] }
  0x5d   : > { %v1999_v53 = vld [vmem:[#allocation2] ss:$2 sm:$0x7]  ;;  %v333_v54 = vmul.f32 %v332_v49, %v1997_v52  ;;  %v344_v60 = vmul.f32 %v343_v57, %v1997_v52  ;;  %v322_v61 = vmul.f32 %v321_v58, %v1997_v52  ;;  %v410_v20 = vmul.f32 %v409_v14, %v1997_v52 }
  0x5e   : > { %v309_v55 = vmul.f32 %v308_v50, %v1999_v53  ;;  %v287_v56 = vmul.f32 %v286_v51, %v1999_v53  ;;  %v298_v62 = vmul.f32 %v297_v59, %v1999_v53  ;;  %v380_v8 = vmul.f32 %v379_v63, %v1999_v53  ;;  %v539_v39 = vld [vmem:[#allocation2 + $0x2] ss:$2 sm:$0x3] }
  0x5f   : > { %335 = vrot.lane.b32.xlu2 %v333_v54, %s1780_s30  ;;  %v370_v10 = vmul.f32 %v369_v0, %v1999_v53  ;;  %v390_v12 = vmul.f32 %v389_v5, %v1999_v53  ;;  %v400_v22 = vmul.f32 %v399_v16, %v1997_v52  ;;  %v420_v24 = vmul.f32 %v419_v18, %v1997_v52 }
  0x60   : > { %311 = vrot.lane.b32.xlu1 %v309_v55, %s1781_s25  ;;  %289 = vrot.lane.b32.xlu0 %v287_v56, %s1782_s5  ;;  %v445_v30 = vmul.f32 %v444_v26, %v1999_v53  ;;  %v465_v31 = vmul.f32 %v464_v28, %v1999_v53  ;;  %v455_v32 = vmul.f32 %v454_v29, %v1999_v53  ;;  %v594_v59 = vstv %s1476_s29  ;;  %s1491_s29 = sld [smem:[#allocation4 + $0x14]] }
  0x61   : > { %v475_v36 = vmul.f32 %v474_v33, %v1997_v52  ;;  %v495_v37 = vmul.f32 %v494_v34, %v1997_v52  ;;  %v485_v38 = vmul.f32 %v484_v35, %v1997_v52  ;;  %v541_v44 = vmul.f32 %v540_v40, %v539_v39 }
  0x62   : > { %v530_v45 = vmul.f32 %v529_v41, %v1999_v53  ;;  %v520_v49 = vmul.f32 %v519_v42, %v1999_v53  ;;  %v200_v50 = vmax.f32 %v194_v46, %v1941_v6  ;;  %v207_v51 = vmax.f32 %v201_v48, %v1953_v11 }
  0x63   : > { %v571_v54 = vmul.f32 %v570_v1, %v1997_v52  ;;  %v561_v55 = vmul.f32 %v560_v3, %v1997_v52  ;;  %v551_v56 = vmul.f32 %v550_v7, %v1997_v52  ;;  %v644_v16 = vstv %s1481_s23  ;;  %s1493_s23 = sld [smem:[#allocation4 + $0x22]] }
  0x64   : > { %v206_v2 = vmax.f32 %v200_v50, %v1949_v9  ;;  %v213_v4 = vmax.f32 %v207_v51, %v1961_v15  ;;  %v645_v28 = vmul.f32 %v644_v16, %v1997_v52  ;;  %v679_v33 = vstv %s1484_s7  ;;  %s1499_s7 = sld [smem:[#allocation4 + $0x46]] }
  0x65   : > { %v709_v39 = vstv %s1487_s20  ;;  %s1511_s20 = sld [smem:[#allocation4 + $0x3a]] }
  0x66   : > { %v212_v6 = vmax.f32 %v206_v2, %v1957_v13  ;;  %v219_v11 = vmax.f32 %v213_v4, %v1969_v19  ;;  %v710_v42 = vmul.f32 %v709_v39, %v1997_v52 }
  0x67   : > { %346 = vrot.lane.b32.xlu2 %v344_v60, %s1783_s11 }
  0x68   : > { %324 = vrot.lane.b32.xlu1 %v322_v61, %s1784_s8  ;;  %300 = vrot.lane.b32.xlu0 %v298_v62, %s1785_s13  ;;  %v218_v9 = vmax.f32 %v212_v6, %v1965_v17  ;;  %v225_v15 = vmax.f32 %v219_v11, %v1977_v23  ;;  %v604_v17 = vstv %s2048_s26  ;;  %v614_v23 = vstv %s1478_s9  ;;  %s1492_s26 = sld [smem:[#allocation4 + $0x1b]] }
  0x69   : > { %v595_v61 = vmul.f32 %v594_v59, %v1999_v53  ;;  %v615_v0 = vmul.f32 %v614_v23, %v1997_v52  ;;  %s1490_s9 = sld [smem:[#allocation4 + $0xd]]  ;;  %v774_v1 = vstv %s1493_s23 }
  0x6a   : > { %v224_v57 = vmax.f32 %v218_v9, %v1973_v21  ;;  %v231_v58 = vmax.f32 %v225_v15, %v1985_v27  ;;  %v605_v27 = vmul.f32 %v604_v17, %v1999_v53  ;;  %v775_v6 = vmul.f32 %v774_v1, %v1997_v52  ;;  %s1507_s23 = sld [smem:[#allocation4 + $0x4e]] }
  0x6b   : > { %v839_v15 = vstv %s1499_s7  ;;  %v965_v59 = vstv %s1511_s20  ;;  %s2147_s7 = sld [smem:[#allocation4 + $0x48]] }
  0x6c   : > { %v230_v13 = vmax.f32 %v224_v57, %v1981_v25  ;;  %v250_v19 = vrot.slane %v231_v58, 4  ;;  %s2157_s20 = sld [smem:[#allocation4 + $0x1]] }
  0x6e   : > { %v244_v21 = vrot.slane %v230_v13, 4  ;;  %v251_v60 = vmax.f32 %v231_v58, %v250_v19  ;;  %v764_v43 = vstv %s1492_s26  ;;  %s1506_s26 = sld [smem:[#allocation4 + $0x47]] }
  0x6f   : > { %382 = vrot.lane.b32.xlu2 %v380_v8, %s1785_s13  ;;  %v744_v46 = vstv %s1490_s9  ;;  %v765_v48 = vmul.f32 %v764_v43, %v1997_v52  ;;  %s1512_s9 = sld [smem:[#allocation4 + $0x41]] }
  0x70   : > { %372 = vrot.lane.b32.xlu1 %v370_v10, %s1782_s5  ;;  %392 = vrot.lane.b32.xlu0 %v390_v12, %s1781_s25  ;;  %v245_v62 = vmax.f32 %v230_v13, %v244_v21  ;;  %v252_v63 = vrot.slane %v251_v60, 2  ;;  %v634_v10 = vstv %s2064_s15  ;;  %v624_v12 = vstv %s1479_s22  ;;  %s1495_s15 = sld [smem:[#allocation4 + $0x30]] }
  0x71   : > { %s1494_s22 = sld [smem:[#allocation4 + $0x29]]  ;;  %v745_v50 = vmul.f32 %v744_v46, %v1999_v53 }
  0x72   : > { %v246_v25 = vrot.slane %v245_v62, 2  ;;  %v253_v5 = vmax.f32 %v251_v60, %v252_v63 }
  0x74   : > { %v247_v8 = vmax.f32 %v245_v62, %v246_v25  ;;  %v254_v14 = vrot.slane %v253_v5, 1 }
  0x76   : > { %v248_v18 = vrot.slane %v247_v8, 1  ;;  %v794_v51 = vstv %s1495_s15  ;;  %s1501_s15 = sld [smem:[#allocation4 + $0x54]] }
  0x77   : > { %412 = vrot.lane.b32.xlu2 %v410_v20, %s1780_s30  ;;  %v255_v20 = vmax.f32 %v253_v5, %v254_v14  ;;  %v784_v2 = vstv %s1494_s22  ;;  %v795_v3 = vmul.f32 %v794_v51, %v1997_v52  ;;  %s1518_s22 = sld [smem:[#allocation4 + $0x3b]]  ;;  %v975_v5 = vstv %s1512_s9 }
  0x78   : > { %402 = vrot.lane.b32.xlu1 %v400_v22, %s1784_s8  ;;  %422 = vrot.lane.b32.xlu0 %v420_v24, %s1783_s11  ;;  %v635_v22 = vmul.f32 %v634_v10, %v1997_v52  ;;  %v625_v24 = vmul.f32 %v624_v12, %v1997_v52  ;;  %v249_v26 = vmax.f32 %v247_v8, %v248_v18  ;;  %s2178_s9 = sld [smem:[#allocation4 + $0x4f]] }
  0x79   : > { %v274_v29 = vrot.slane %v255_v20, 7  ;;  %v785_v7 = vmul.f32 %v784_v2, %v1997_v52 }
  0x7c   : > { %v861_v16 = vstv %s1501_s15  ;;  %s2190_s15 = sld [smem:[#allocation4 + $0x43]] }
  0x7d   : > { %v1037_v18 = vstv %s1518_s22  ;;  %s2203_s22 = sld [smem:[#allocation4 + $0x49]] }
  0x7f   : > { %447 = vrot.lane.b32.xlu2 %v445_v30, %s1782_s5  ;;  %v275_v30 = vsel %vm263_vm0, %v249_v26, %v274_v29 }
  0x80   : > { %467 = vrot.lane.b32.xlu1 %v465_v31, %s1781_s25  ;;  %457 = vrot.lane.b32.xlu0 %v455_v32, %s1785_s13  ;;  %278 = vst.msk [vmem:[#allocation2 + $0x3] ss:$2 sm:$0x3] %vm1990_vm1, %v275_v30  ;;  %v669_v31 = vstv %s1483_s4  ;;  %v689_v32 = vstv %s1485_s6  ;;  %s1498_s4 = sld [smem:[#allocation4 + $0x3f]] }
  0x81   : > { %v670_v34 = vmul.f32 %v669_v31, %v1999_v53  ;;  %v690_v35 = vmul.f32 %v689_v32, %v1997_v52  ;;  %s1497_s6 = sld [smem:[#allocation4 + $0x38]] }
  0x87   : > { %477 = vrot.lane.b32.xlu2 %v475_v36, %s1784_s8  ;;  %v680_v36 = vmul.f32 %v679_v33, %v1999_v53  ;;  %v2113_v11 = vld [vmem:[#allocation2 + $0x1] ss:$2 sm:$0x7] }
  0x88   : > { %497 = vrot.lane.b32.xlu1 %v495_v37, %s1783_s11  ;;  %487 = vrot.lane.b32.xlu0 %v485_v38, %s1780_s30  ;;  %v699_v37 = vstv %s1486_s10  ;;  %v719_v38 = vstv %s1488_s14  ;;  %s1505_s10 = sld [smem:[#allocation4 + $0x40]]  ;;  %v840_v57 = vmul.f32 %v839_v15, %v2113_v11  ;;  %v2133_v62 = vld [vmem:[#allocation2 + $0x3] ss:$2 sm:$0x7]  ;;  %v976_v14 = vmul.f32 %v975_v5, %v2113_v11 }
  0x89   : > { %v700_v40 = vmul.f32 %v699_v37, %v1997_v52  ;;  %v720_v41 = vmul.f32 %v719_v38, %v1997_v52  ;;  %s1504_s14 = sld [smem:[#allocation4 + $0x39]]  ;;  %v1038_v29 = vmul.f32 %v1037_v18, %v2113_v11 }
  0x8e   : > { %v903_v58 = vstv %s1505_s10  ;;  %s2151_s10 = sld [smem:[#allocation4 + $0x3c]] }
  0x8f   : > { %543 = vrot.lane.b32.xlu2 %v541_v44, %s1781_s25  ;;  %v754_v44 = vstv %s1491_s29  ;;  %v893_v13 = vstv %s1504_s14  ;;  %s1500_s29 = sld [smem:[#allocation4 + $0x4d]]  ;;  %v904_v21 = vmul.f32 %v903_v58, %v2113_v11 }
  0x90   : > { %532 = vrot.lane.b32.xlu1 %v530_v45, %s1785_s13  ;;  %522 = vrot.lane.b32.xlu0 %v520_v49, %s1782_s5  ;;  %v755_v49 = vmul.f32 %v754_v44, %v1999_v53  ;;  %v894_v60 = vmul.f32 %v893_v13, %v2113_v11  ;;  %s2153_s14 = sld [smem:[#allocation4 + $0x2]]  ;;  %v365_v44 = vstv %s2157_s20 }
  0x91   : > { %s1509_s20 = sld [smem:[#allocation4 + $0x5c]] }
  0x95   : > { %v851_v63 = vstv %s1500_s29  ;;  %s2170_s29 = sld [smem:[#allocation4 + $0x5b]] }
  0x96   : > { %v852_v12 = vmul.f32 %v851_v63, %v2133_v62 }
  0x97   : > { %573 = vrot.lane.b32.xlu2 %v571_v54, %s1783_s11  ;;  %v829_v54 = vstv %s1498_s4  ;;  %s280_s4 = sld [smem:[#allocation4]] }
  0x98   : > { %563 = vrot.lane.b32.xlu1 %v561_v55, %s1780_s30  ;;  %553 = vrot.lane.b32.xlu0 %v551_v56, %s1784_s8  ;;  %v819_v55 = vstv %s1497_s6  ;;  %v830_v56 = vmul.f32 %v829_v54, %v2113_v11  ;;  %s2144_s6 = sld [smem:[#allocation4 + $0x42]] }
  0x99   : > { %v820_v52 = vmul.f32 %v819_v55, %v2113_v11 }
  0x9d   : > { %v282_v31 = vstv %s280_s4  ;;  %s1786_s4 = smov 51  }
  0x9f   : > { %607 = vrot.lane.b32.xlu2 %v605_v27, %s1785_s13  ;;  %v966_v27 = vmul.f32 %v965_v59, %v2113_v11 }
  0xa0   : > { %597 = vrot.lane.b32.xlu1 %v595_v61, %s1782_s5  ;;  %617 = vrot.lane.b32.xlu0 %v615_v0, %s1781_s25  ;;  %v913_v61 = vstv %s1506_s26  ;;  %s2164_s26 = sld [smem:[#allocation4 + $0x55]] }
  0xa1   : > { %v914_v10 = vmul.f32 %v913_v61, %v2113_v11 }
  0xa6   : > { %v933_v54 = vstv %s2164_s26  ;;  %s2570_s26 = smov 47  }
  0xa7   : > { %637 = vrot.lane.b32.xlu2 %v635_v22, %s1780_s30 }
  0xa8   : > { %627 = vrot.lane.b32.xlu1 %v625_v24, %s1784_s8  ;;  %647 = vrot.lane.b32.xlu0 %v645_v28, %s1783_s11  ;;  %v923_v24 = vstv %s1507_s23  ;;  %v862_v28 = vmul.f32 %v861_v16, %v2133_v62  ;;  %v1120_v16 = vstv %s2190_s15  ;;  %s2225_s23 = sld [smem:[#allocation4 + $0x3]] }
  0xa9   : > { %v924_v30 = vmul.f32 %v923_v24, %v2133_v62  ;;  %s1515_s15 = sld [smem:[#allocation4 + $0x56]] }
  0xaf   : > { %672 = vrot.lane.b32.xlu2 %v670_v34, %s1782_s5  ;;  %v283_v34 = vmul.f32 %v282_v31, %v1999_v53  ;;  %v1058_v31 = vstv %s2203_s22  ;;  %s1516_s22 = sld [smem:[#allocation4 + $0x5d]] }
  0xb0   : > { %692 = vrot.lane.b32.xlu1 %v690_v35, %s1781_s25  ;;  %682 = vrot.lane.b32.xlu0 %v680_v36, %s1785_s13  ;;  %v1047_v35 = vstv %s2144_s6  ;;  %v985_v36 = vstv %s2147_s7  ;;  %s1475_s6 = sld [smem:[#allocation4 + $0x4]]  ;;  %s1787_s7 = smov 50  }
  0xb1   : > { %v1048_v46 = vmul.f32 %v1047_v35, %v2113_v11 }
  0xb7   : > { %702 = vrot.lane.b32.xlu2 %v700_v40, %s1784_s8  ;;  %v1110_v40 = vstv %s2151_s10  ;;  %s1788_s10 = smov 49  }
  0xb8   : > { %722 = vrot.lane.b32.xlu1 %v720_v41, %s1783_s11  ;;  %712 = vrot.lane.b32.xlu0 %v710_v42, %s1780_s30  ;;  %v440_v41 = vstv %s2153_s14  ;;  %v1111_v2 = vmul.f32 %v1110_v40, %v2113_v11  ;;  %s1482_s14 = sld [smem:[#allocation4 + $0x5]] }
  0xb9   : > { %v2097_v45 = vpop.permute.xlu2 %335 }
  0xbf   : > { %767 = vrot.lane.b32.xlu2 %v765_v48, %s1781_s25  ;;  %v986_v48 = vmul.f32 %v985_v36, %v2113_v11 }
  0xc0   : > { %757 = vrot.lane.b32.xlu1 %v755_v49, %s1785_s13  ;;  %747 = vrot.lane.b32.xlu0 %v745_v50, %s1782_s5 }
  0xc1   : > { %v2105_v4 = vpop.permute.xlu2 %346 }
  0xc7   : > { %797 = vrot.lane.b32.xlu2 %v795_v3, %s1783_s11 }
  0xc8   : > { %787 = vrot.lane.b32.xlu1 %v785_v7, %s1780_s30  ;;  %777 = vrot.lane.b32.xlu0 %v775_v6, %s1784_s8  ;;  %v441_v7 = vmul.f32 %v440_v41, %v1999_v53  ;;  %v366_v6 = vmul.f32 %v365_v44, %v1999_v53 }
  0xc9   : > { %v2115_v9 = vpop.permute.xlu2 %382 }
  0xca   : > { %v384_v55 = vrot.slane %v2115_v9, 1 }
  0xcf   : > { %832 = vrot.lane.b32.xlu2 %v830_v56, %s1785_s13 }
  0xd0   : > { %822 = vrot.lane.b32.xlu1 %v820_v52, %s1782_s5  ;;  %842 = vrot.lane.b32.xlu0 %v840_v57, %s1781_s25  ;;  %v871_v52 = vstv %s2170_s29  ;;  %s1527_s29 = sld [smem:[#allocation4 + $0x4a]] }
  0xd1   : > { %v2123_v19 = vpop.permute.xlu2 %412  ;;  %v872_v5 = vmul.f32 %v871_v52, %v2133_v62 }
  0xd2   : > { %v2125_v17 = vpop.permute.xlu1 %311  ;;  %v290_v23 = vpop.permute.xlu0 %289 }
  0xd3   : > { %v291_v32 = vrot.slane %v290_v23, 1  ;;  %v313_v1 = vrot.slane %v2125_v17, 1 }
  0xd5   : > { %v293_v37 = vsel %vm292_vm2, %v290_v23, %v291_v32  ;;  %v315_v57 = vsel %vm314_vm4, %v2125_v17, %v313_v1  ;;  %v995_v23 = vstv %s2178_s9  ;;  %v385_v17 = vsel %vm303_vm3, %v2115_v9, %v384_v55  ;;  %s1489_s9 = sld [smem:[#allocation4 + $0x6]] }
  0xd6   : > { %v295_v49 = vadd.f32 %v293_v37, %v283_v34  ;;  %v414_v34 = vrot.slane %v2123_v19, 7  ;;  %v1121_v37 = vmul.f32 %v1120_v16, %v2113_v11 }
  0xd7   : > { %906 = vrot.lane.b32.xlu2 %v904_v21, %s1785_s13 }
  0xd8   : > { %896 = vrot.lane.b32.xlu1 %v894_v60, %s1782_s5  ;;  %968 = vrot.lane.b32.xlu0 %v966_v27, %s1782_s5  ;;  %v934_v27 = vmul.f32 %v933_v54, %v2133_v62 }
  0xd9   : > { %v2135_v0 = vpop.permute.xlu2 %447 }
  0xda   : > { %v2137_v25 = vpop.permute.xlu1 %324  ;;  %v301_v8 = vpop.permute.xlu0 %300  ;;  %v449_v50 = vrot.slane %v2135_v0, 1 }
  0xdb   : > { %v302_v33 = vrot.slane %v301_v8, 1  ;;  %v326_v58 = vrot.slane %v2137_v25, 7 }
  0xdc   : > { %v450_v15 = vsel %vm292_vm2, %v2135_v0, %v449_v50 }
  0xdd   : > { %v304_v43 = vsel %vm303_vm3, %v301_v8, %v302_v33  ;;  %v452_v61 = vadd.f32 %v450_v15, %v441_v7  ;;  %v996_v8 = vmul.f32 %v995_v23, %v2133_v62  ;;  %v348_v33 = vrot.slane %v2105_v4, 7 }
  0xde   : > { %v306_v3 = vadd.f32 %v304_v43, %v295_v49 }
  0xdf   : > { %916 = vrot.lane.b32.xlu2 %v914_v10, %s1781_s25  ;;  %v337_v10 = vrot.slane %v2097_v45, 7 }
  0xe0   : > { %854 = vrot.lane.b32.xlu1 %v852_v12, %s1784_s8  ;;  %978 = vrot.lane.b32.xlu0 %v976_v14, %s1785_s13  ;;  %v317_v21 = vadd.f32 %v315_v57, %v306_v3  ;;  %v328_v12 = vsel %vm327_vm5, %v326_v58, %v2137_v25  ;;  %v1057_v25 = vld [vmem:[#allocation2 + $0x3] ss:$2 sm:$0x3] }
  0xe1   : > { %v2149_v20 = vpop.permute.xlu2 %477  ;;  %v339_v32 = vsel %vm338_vm6, %v337_v10, %v2097_v45  ;;  %v1059_v50 = vmul.f32 %v1058_v31, %v1057_v25 }
  0xe2   : > { %v373_v22 = vpop.permute.xlu1 %372  ;;  %v2155_v26 = vpop.permute.xlu0 %392  ;;  %v330_v18 = vadd.f32 %v328_v12, %v317_v21  ;;  %v479_v9 = vrot.slane %v2149_v20, 7 }
  0xe3   : > { %v374_v51 = vrot.slane %v373_v22, 1 }
  0xe4   : > { %v341_v45 = vadd.f32 %v339_v32, %v330_v18 }
  0xe5   : > { %v375_v56 = vsel %vm292_vm2, %v373_v22, %v374_v51  ;;  %v394_v22 = vrot.slane %v2155_v26, 1  ;;  %v480_v51 = vsel %vm327_vm5, %v479_v9, %v2149_v20 }
  0xe6   : > { %v377_v63 = vadd.f32 %v375_v56, %v366_v6  ;;  %v515_v6 = vstv %s2225_s23  ;;  %s1790_s23 = smov 46  }
  0xe7   : > { %864 = vrot.lane.b32.xlu2 %v862_v28, %s1780_s30  ;;  %v395_v40 = vsel %vm314_vm4, %v2155_v26, %v394_v22  ;;  %v415_v26 = vsel %vm338_vm6, %v414_v34, %v2123_v19  ;;  %v516_v19 = vmul.f32 %v515_v6, %v1999_v53 }
  0xe8   : > { %1040 = vrot.lane.b32.xlu1 %v1038_v29, %s1782_s5  ;;  %926 = vrot.lane.b32.xlu0 %v924_v30, %s1784_s8  ;;  %v387_v29 = vadd.f32 %v385_v17, %v377_v63 }
  0xe9   : > { %v2173_v38 = vpop.permute.xlu2 %543 }
  0xea   : > { %v2175_v39 = vpop.permute.xlu1 %402  ;;  %v2181_v42 = vpop.permute.xlu0 %422  ;;  %v545_v63 = vrot.slane %v2173_v38, 7 }
  0xeb   : > { %v404_v24 = vrot.slane %v2175_v39, 7  ;;  %v424_v54 = vrot.slane %v2181_v42, 7 }
  0xec   : > { %v546_v10 = vsel %vm314_vm4, %v545_v63, %v2173_v38 }
  0xed   : > { %v405_v41 = vsel %vm327_vm5, %v404_v24, %v2175_v39 }
  0xef   : > { %1050 = vrot.lane.b32.xlu2 %v1048_v46, %s1785_s13  ;;  %v397_v46 = vadd.f32 %v395_v40, %v387_v29 }
  0xf0   : > { %988 = vrot.lane.b32.xlu1 %v986_v48, %s1781_s25  ;;  %1113 = vrot.lane.b32.xlu0 %v1111_v2, %s1782_s5  ;;  %v350_v2 = vsel %vm349_vm7, %v348_v33, %v2105_v4 }
  0xf1   : > { %v2208_v13 = vpop.permute.xlu2 %573  ;;  %v407_v1 = vadd.f32 %v405_v41, %v397_v46  ;;  %v352_v3 = vadd.f32 %v350_v2, %v341_v45 }
  0xf2   : > { %v468_v59 = vpop.permute.xlu1 %467  ;;  %v458_v60 = vpop.permute.xlu0 %457  ;;  %v575_v18 = vrot.slane %v2208_v13, 7 }
  0xf3   : > { %v459_v0 = vrot.slane %v458_v60, 1  ;;  %v469_v28 = vrot.slane %v468_v59, 1  ;;  %v417_v4 = vadd.f32 %v415_v26, %v407_v1 }
  0xf4   : > { %v576_v25 = vsel %vm349_vm7, %v575_v18, %v2208_v13 }
  0xf5   : > { %v460_v14 = vsel %vm303_vm3, %v458_v60, %v459_v0  ;;  %v470_v43 = vsel %vm314_vm4, %v468_v59, %v469_v28  ;;  %v425_v59 = vsel %vm349_vm7, %v424_v54, %v2181_v42  ;;  %v590_v28 = vstv %s1475_s6  ;;  %s1533_s6 = sld [smem:[#allocation4 + $0x44]] }
  0xf6   : > { %v462_v30 = vadd.f32 %v460_v14, %v452_v61  ;;  %v427_v21 = vadd.f32 %v425_v59, %v417_v4  ;;  %v591_v38 = vmul.f32 %v590_v28, %v1999_v53 }
  0xf7   : > { %936 = vrot.lane.b32.xlu2 %v934_v27, %s1780_s30 }
  0xf8   : > { %874 = vrot.lane.b32.xlu1 %v872_v5, %s1783_s11  ;;  %998 = vrot.lane.b32.xlu0 %v996_v8, %s1784_s8  ;;  %v472_v48 = vadd.f32 %v470_v43, %v462_v30 }
  0xf9   : > { %v2234_v35 = vpop.permute.xlu2 %607 }
  0xfa   : > { %v498_v36 = vpop.permute.xlu1 %497  ;;  %v488_v44 = vpop.permute.xlu0 %487  ;;  %v482_v7 = vadd.f32 %v480_v51, %v472_v48  ;;  %v609_v30 = vrot.slane %v2234_v35, 1 }
  0xfb   : > { %v489_v49 = vrot.slane %v488_v44, 7  ;;  %v499_v55 = vrot.slane %v498_v36, 7 }
  0xfd   : > { %v490_v39 = vsel %vm338_vm6, %v489_v49, %v488_v44  ;;  %v500_v23 = vsel %vm349_vm7, %v499_v55, %v498_v36 }
  0xfe   : > { %v492_v20 = vadd.f32 %v490_v39, %v482_v7 }
  0xff   : > { %1123 = vrot.lane.b32.xlu2 %v1121_v37, %s1785_s13  ;;  %v610_v37 = vsel %vm303_vm3, %v2234_v35, %v609_v30 }
 0x100   : > { %1061 = vrot.lane.b32.xlu1 %v1059_v50, %s1781_s25  ;;  %354 = vrot.lane.b32.xlu0 %v352_v3, %s1786_s4  ;;  %v502_v27 = vadd.f32 %v500_v23, %v492_v20  ;;  %v665_v50 = vstv %s1482_s14  ;;  %s1534_s14 = sld [smem:[#allocation4 + $0x4b]] }
 0x101   : > { %v638_v15 = vpop.permute.xlu2 %637  ;;  %v666_v7 = vmul.f32 %v665_v50, %v1999_v53 }
 0x102   : > { %v533_v56 = vpop.permute.xlu1 %532  ;;  %v523_v52 = vpop.permute.xlu0 %522  ;;  %v639_v45 = vrot.slane %v638_v15, 7 }
 0x103   : > { %v534_v57 = vrot.slane %v533_v56, 1  ;;  %v524_v58 = vrot.slane %v523_v52, 1 }
 0x104   : > { %v640_v35 = vsel %vm338_vm6, %v639_v45, %v638_v15  ;;  %v943_v15 = vstv %s1509_s20  ;;  %s1522_s20 = sld [smem:[#allocation4 + $0x57]] }
 0x105   : > { %v525_v60 = vsel %vm292_vm2, %v523_v52, %v524_v58  ;;  %v535_v0 = vsel %vm303_vm3, %v533_v56, %v534_v57 }
 0x106   : > { %v527_v61 = vadd.f32 %v525_v60, %v516_v19 }
 0x107   : > { %504 = vrot.lane.b32.xlu2 %v502_v27, %s1788_s10  ;;  %v944_v27 = vmul.f32 %v943_v15, %v2133_v62 }
 0x108   : > { %429 = vrot.lane.b32.xlu1 %v427_v21, %s1787_s7  ;;  %v537_v5 = vadd.f32 %v535_v0, %v527_v61 }
 0x109   : > { %v673_v42 = vpop.permute.xlu2 %672 }
 0x10a   : > { %v564_v17 = vpop.permute.xlu1 %563  ;;  %v554_v8 = vpop.permute.xlu0 %553  ;;  %v548_v16 = vadd.f32 %v546_v10, %v537_v5  ;;  %v674_v51 = vrot.slane %v673_v42, 1  ;;  %v1130_v10 = vstv %s1527_s29  ;;  %s1529_s29 = sld [smem:[#allocation4 + $0x58]] }
 0x10b   : > { %v565_v12 = vrot.slane %v564_v17, 7  ;;  %v555_v14 = vrot.slane %v554_v8, 7 }
 0x10c   : > { %v675_v6 = vsel %vm292_vm2, %v673_v42, %v674_v51  ;;  %v1202_v51 = vstv %s1534_s14  ;;  %s1530_s14 = sld [smem:[#allocation4 + $0x5f]] }
 0x10d   : > { %v556_v22 = vsel %vm327_vm5, %v555_v14, %v554_v8  ;;  %v566_v29 = vsel %vm338_vm6, %v565_v12, %v564_v17  ;;  %v677_v56 = vadd.f32 %v675_v6, %v666_v7 }
 0x10e   : > { %v558_v24 = vadd.f32 %v556_v22, %v548_v16  ;;  %v740_v22 = vstv %s1489_s9  ;;  %s1532_s9 = sld [smem:[#allocation4 + $0x3d]] }
 0x10f   : > { %v741_v30 = vmul.f32 %v740_v22, %v1999_v53 }
 0x110   : > { %v568_v9 = vadd.f32 %v566_v29, %v558_v24  ;;  %v1131_v24 = vmul.f32 %v1130_v10, %v2133_v62 }
 0x111   : > { %v703_v31 = vpop.permute.xlu2 %702 }
 0x112   : > { %v598_v32 = vpop.permute.xlu1 %597  ;;  %v618_v34 = vpop.permute.xlu0 %617  ;;  %v578_v36 = vadd.f32 %v576_v25, %v568_v9  ;;  %v704_v58 = vrot.slane %v703_v31, 7 }
 0x113   : > { %v599_v33 = vrot.slane %v598_v32, 1  ;;  %v619_v43 = vrot.slane %v618_v34, 7 }
 0x114   : > { %580 = vrot.lane.b32.xlu0 %v578_v36, %s1780_s30  ;;  %v705_v63 = vsel %vm327_vm5, %v704_v58, %v703_v31 }
 0x115   : > { %v600_v40 = vsel %vm292_vm2, %v598_v32, %v599_v33  ;;  %v620_v46 = vsel %vm314_vm4, %v619_v43, %v618_v34  ;;  %v1015_v32 = vstv %s1516_s22  ;;  %s2322_s22 = sld [smem:[#allocation4 + $0x45]] }
 0x116   : > { %v602_v41 = vadd.f32 %v600_v40, %v591_v38  ;;  %v1005_v38 = vstv %s1515_s15  ;;  %v1016_v53 = vmul.f32 %v1015_v32, %v2133_v62  ;;  %s1503_s15 = sld [smem:[#allocation4 + $0x32]] }
 0x117   : > { %v1006_v36 = vmul.f32 %v1005_v38, %v2133_v62 }
 0x118   : > { %v612_v44 = vadd.f32 %v610_v37, %v602_v41 }
 0x119   : > { %v2277_v1 = vpop.permute.xlu2 %767 }
 0x11a   : > { %v628_v13 = vpop.permute.xlu1 %627  ;;  %v648_v49 = vpop.permute.xlu0 %647  ;;  %v622_v2 = vadd.f32 %v620_v46, %v612_v44  ;;  %v769_v37 = vrot.slane %v2277_v1, 7 }
 0x11b   : > { %v629_v48 = vrot.slane %v628_v13, 7  ;;  %v649_v39 = vrot.slane %v648_v49, 7 }
 0x11d   : > { %v630_v26 = vsel %vm327_vm5, %v629_v48, %v628_v13  ;;  %v650_v55 = vsel %vm349_vm7, %v649_v39, %v648_v49  ;;  %v770_v13 = vsel %vm314_vm4, %v769_v37, %v2277_v1  ;;  %v1192_v49 = vstv %s1533_s6  ;;  %s2571_s6 = smov 45  }
 0x11e   : > { %v632_v3 = vadd.f32 %v630_v26, %v622_v2  ;;  %v1193_v39 = vmul.f32 %v1192_v49, %v2113_v11 }
 0x120   : > { %v642_v54 = vadd.f32 %v640_v35, %v632_v3  ;;  %v1203_v3 = vmul.f32 %v1202_v51, %v2133_v62 }
 0x121   : > { %v2285_v59 = vpop.permute.xlu2 %797 }
 0x122   : > { %v652_v4 = vadd.f32 %v650_v55, %v642_v54  ;;  %v693_v20 = vpop.permute.xlu1 %692  ;;  %v683_v19 = vpop.permute.xlu0 %682  ;;  %v799_v2 = vrot.slane %v2285_v59, 7 }
 0x123   : > { %v694_v52 = vrot.slane %v693_v20, 7  ;;  %v684_v57 = vrot.slane %v683_v19, 1 }
 0x124   : > { %654 = vrot.lane.b32.xlu1 %v652_v4, %s2570_s26  ;;  %v800_v6 = vsel %vm349_vm7, %v799_v2, %v2285_v59  ;;  %s1521_s26 = sld [smem:[#allocation4 + $0x50]] }
 0x125   : > { %v685_v23 = vsel %vm303_vm3, %v683_v19, %v684_v57  ;;  %v695_v60 = vsel %vm314_vm4, %v694_v52, %v693_v20  ;;  %v1150_v19 = vstv %s1529_s29  ;;  %v1182_v52 = vstv %s1532_s9  ;;  %s2336_s29 = sld [smem:[#allocation4 + $0x52]] }
 0x126   : > { %v687_v21 = vadd.f32 %v685_v23, %v677_v56  ;;  %v1078_v56 = vstv %s1522_s20  ;;  %v889_v57 = vstv %s1503_s15  ;;  %v1151_v58 = vmul.f32 %v1150_v19, %v2133_v62  ;;  %s2329_s20 = sld [smem:[#allocation4 + $0x31]] }
 0x127   : > { %v1079_v15 = vmul.f32 %v1078_v56, %v2133_v62  ;;  %v1183_v23 = vmul.f32 %v1182_v52, %v2113_v11  ;;  %s1537_s9 = sld [smem:[#allocation4 + $0x60]] }
 0x128   : > { %v697_v61 = vadd.f32 %v695_v60, %v687_v21  ;;  %v890_v21 = vmul.f32 %v889_v57, %v2113_v11  ;;  %s1539_s15 = sld [smem:[#allocation4 + $0x3e]] }
 0x129   : > { %v2293_v16 = vpop.permute.xlu2 %832 }
 0x12a   : > { %v723_v0 = vpop.permute.xlu1 %722  ;;  %v713_v5 = vpop.permute.xlu0 %712  ;;  %v707_v8 = vadd.f32 %v705_v63, %v697_v61  ;;  %v1264_v63 = vstv %s2322_s22  ;;  %v1068_v10 = vstv %s1521_s26  ;;  %s2354_s26 = sld [smem:[#allocation4 + $0x59]]  ;;  %v834_v32 = vrot.slane %v2293_v16, 1 }
 0x12b   : > { %v724_v42 = vrot.slane %v723_v0, 7  ;;  %v714_v17 = vrot.slane %v713_v5, 7  ;;  %v1069_v22 = vmul.f32 %v1068_v10, %v2133_v62  ;;  %s1528_s22 = sld [smem:[#allocation4 + $0x51]] }
 0x12c   : > { %946 = vrot.lane.b32.xlu1 %v944_v27, %s1783_s11 }
 0x12d   : > { %v715_v12 = vsel %vm338_vm6, %v714_v17, %v713_v5  ;;  %v725_v18 = vsel %vm349_vm7, %v724_v42, %v723_v0  ;;  %v1160_v42 = vstv %s1530_s14  ;;  %s1542_s14 = sld [smem:[#allocation4 + $0x53]] }
 0x12e   : > { %v717_v14 = vadd.f32 %v715_v12, %v707_v8  ;;  %v1265_v12 = vmul.f32 %v1264_v63, %v2113_v11  ;;  %v1254_v38 = vstv %s1539_s15 }
 0x130   : > { %v727_v28 = vadd.f32 %v725_v18, %v717_v14  ;;  %v1161_v18 = vmul.f32 %v1160_v42, %v2133_v62 }
 0x131   : > { %v907_v43 = vpop.permute.xlu2 %906 }
 0x132   : > { %v758_v29 = vpop.permute.xlu1 %757  ;;  %729 = vrot.lane.b32.xlu2 %v727_v28, %s1790_s23  ;;  %v748_v9 = vpop.permute.xlu0 %747  ;;  %v908_v59 = vrot.slane %v907_v43, 1  ;;  %v815_v28 = vstv %s2329_s20  ;;  %s1544_s20 = sld [smem:[#allocation4 + $0x61]] }
 0x133   : > { %v759_v25 = vrot.slane %v758_v29, 1  ;;  %v749_v31 = vrot.slane %v748_v9, 1 }
 0x134   : > { %1133 = vrot.lane.b32.xlu1 %v1131_v24, %s1781_s25  ;;  %v909_v0 = vsel %vm303_vm3, %v907_v43, %v908_v59 }
 0x135   : > { %v750_v33 = vsel %vm292_vm2, %v748_v9, %v749_v31  ;;  %v760_v40 = vsel %vm303_vm3, %v758_v29, %v759_v25  ;;  %v1212_v9 = vstv %s2336_s29  ;;  %v1232_v25 = vstv %s1537_s9 }
 0x136   : > { %v752_v34 = vadd.f32 %v750_v33, %v741_v30  ;;  %v816_v31 = vmul.f32 %v815_v28, %v2113_v11 }
 0x138   : > { %v762_v41 = vadd.f32 %v760_v40, %v752_v34  ;;  %v1233_v40 = vmul.f32 %v1232_v25, %v2133_v62 }
 0x139   : > { %v2319_v20 = vpop.permute.xlu2 %916 }
 0x13a   : > { %v788_v44 = vpop.permute.xlu1 %787  ;;  %1008 = vrot.lane.b32.xlu2 %v1006_v36, %s1780_s30  ;;  %v778_v45 = vpop.permute.xlu0 %777  ;;  %v772_v50 = vadd.f32 %v770_v13, %v762_v41  ;;  %v1213_v36 = vmul.f32 %v1212_v9, %v2133_v62  ;;  %v1255_v41 = vmul.f32 %v1254_v38, %v2113_v11  ;;  %v835_v13 = vsel %vm303_vm3, %v2293_v16, %v834_v32  ;;  %v2407_v32 = vld [vmem:[#allocation8] ss:$8 sm:$0x3] }
 0x13b   : > { %v789_v46 = vrot.slane %v788_v44, 7  ;;  %v779_v48 = vrot.slane %v778_v45, 7  ;;  %v1284_v9 = vstv %s1542_s14 }
 0x13c   : > { %1018 = vrot.lane.b32.xlu1 %v1016_v53, %s1783_s11  ;;  %v1285_v38 = vmul.f32 %v1284_v9, %v2133_v62 }
 0x13d   : > { %v780_v35 = vsel %vm327_vm5, %v779_v48, %v778_v45  ;;  %v790_v1 = vsel %vm338_vm6, %v789_v46, %v788_v44 }
 0x13e   : > { %v782_v26 = vadd.f32 %v780_v35, %v772_v50  ;;  %v1222_v50 = vstv %s2354_s26 }
 0x140   : > { %v792_v7 = vadd.f32 %v790_v1, %v782_v26 }
 0x141   : > { %v2341_v17 = vpop.permute.xlu2 %864 }
 0x142   : > { %v823_v54 = vpop.permute.xlu1 %822  ;;  %v2316_v55 = vpop.permute.xlu0 %842  ;;  %v802_v4 = vadd.f32 %v800_v6, %v792_v7  ;;  %1195 = vrot.lane.b32.xlu2 %v1193_v39, %s1785_s13  ;;  %v1140_v39 = vstv %s1528_s22  ;;  %v866_v19 = vrot.slane %v2341_v17, 7 }
 0x143   : > { %v824_v29 = vrot.slane %v823_v54, 1  ;;  %v844_v46 = vrot.slane %v2316_v55, 1  ;;  %v1141_v6 = vmul.f32 %v1140_v39, %v2133_v62 }
 0x144   : > { %1205 = vrot.lane.b32.xlu1 %v1203_v3, %s1781_s25  ;;  %804 = vrot.lane.b32.xlu0 %v802_v4, %s2571_s6  ;;  %s1517_s6 = sld [smem:[#allocation4 + $0x34]]  ;;  %v1223_v3 = vmul.f32 %v1222_v50, %v2133_v62 }
 0x145   : > { %v825_v33 = vsel %vm292_vm2, %v823_v54, %v824_v29  ;;  %v845_v16 = vsel %vm314_vm4, %v2316_v55, %v844_v46 }
 0x146   : > { %v827_v43 = vadd.f32 %v825_v33, %v816_v31 }
 0x148   : > { %v837_v35 = vadd.f32 %v835_v13, %v827_v43 }
 0x149   : > { %v1051_v37 = vpop.permute.xlu2 %1050 }
 0x14a   : > { %v897_v60 = vpop.permute.xlu1 %896  ;;  %v2331_v61 = vpop.permute.xlu0 %968  ;;  %1081 = vrot.lane.b32.xlu2 %v1079_v15, %s1780_s30  ;;  %v1033_v34 = vstv %s1517_s6  ;;  %v1052_v53 = vrot.slane %v1051_v37, 1  ;;  %v847_v54 = vadd.f32 %v845_v16, %v837_v35  ;;  %s1543_s6 = sld [smem:[#allocation4 + $0x5a]] }
 0x14b   : > { %v898_v27 = vrot.slane %v897_v60, 1  ;;  %v1034_v44 = vmul.f32 %v1033_v34, %v2113_v11 }
 0x14c   : > { %1153 = vrot.lane.b32.xlu1 %v1151_v58, %s1780_s30  ;;  %1185 = vrot.lane.b32.xlu0 %v1183_v23, %s1782_s5  ;;  %v1053_v51 = vsel %vm303_vm3, %v1051_v37, %v1052_v53  ;;  %v867_v58 = vsel %vm338_vm6, %v866_v19, %v2341_v17 }
 0x14d   : > { %v899_v5 = vsel %vm292_vm2, %v897_v60, %v898_v27 }
 0x14e   : > { %v901_v8 = vadd.f32 %v899_v5, %v890_v21 }
 0x150   : > { %v2344_v14 = vadd.f32 %v909_v0, %v901_v8 }
 0x151   : > { %v2379_v4 = vpop.permute.xlu2 %936 }
 0x152   : > { %v855_v24 = vpop.permute.xlu1 %854  ;;  %v2349_v30 = vpop.permute.xlu0 %978  ;;  %1267 = vrot.lane.b32.xlu2 %v1265_v12, %s1785_s13  ;;  %s1523_s13 = sld [smem:[#allocation4 + $0x5e]] }
 0x153   : > { %v856_v1 = vrot.slane %v855_v24, 7 }
 0x154   : > { %1163 = vrot.lane.b32.xlu1 %v1161_v18, %s1783_s11  ;;  %1071 = vrot.lane.b32.xlu0 %v1069_v22, %s1784_s8  ;;  %v1294_v18 = vstv %s1543_s6 }
 0x155   : > { %v857_v52 = vsel %vm327_vm5, %v856_v1, %v855_v24  ;;  %v1295_v24 = vmul.f32 %v1294_v18, %v2133_v62 }
 0x156   : > { %v859_v55 = vadd.f32 %v857_v52, %v847_v54  ;;  %v2430_v52 = vld [vmem:[#allocation8 + $0x4] ss:$8 sm:$0x3] }
 0x158   : > { %v1088_v15 = vstv %s1523_s13  ;;  %v869_v21 = vadd.f32 %v867_v58, %v859_v55  ;;  %v938_v58 = vrot.slane %v2379_v4, 7 }
 0x159   : > { %v1089_v59 = vmul.f32 %v1088_v15, %v2133_v62  ;;  %v2394_v63 = vpop.permute.xlu2 %1123 }
 0x15a   : > { %v1041_v45 = vpop.permute.xlu1 %1040  ;;  %v2367_v49 = vpop.permute.xlu0 %926  ;;  %1215 = vrot.lane.b32.xlu2 %v1213_v36, %s1784_s8  ;;  %v2410_v36 = vld [vmem:[#allocation8 + $0x1] ss:$8 sm:$0x3] }
 0x15b   : > { %v1042_v48 = vrot.slane %v1041_v45, 1 }
 0x15c   : > { %1235 = vrot.lane.b32.xlu1 %v1233_v40, %s1783_s11  ;;  %1257 = vrot.lane.b32.xlu0 %v1255_v41, %s1782_s5  ;;  %s1541_s5 = sld [smem:[#allocation4 + $0x4c]]  ;;  %v2412_v40 = vld [vmem:[#allocation8 + $0x2] ss:$8 sm:$0x3] }
 0x15d   : > { %v1043_v2 = vsel %vm292_vm2, %v1041_v45, %v1042_v48  ;;  %v1304_v45 = vstv %s1544_s20 }
 0x15e   : > { %v1045_v26 = vadd.f32 %v1043_v2, %v1034_v44  ;;  %v1305_v48 = vmul.f32 %v1304_v45, %v2133_v62  ;;  %v2422_v2 = vld [vmem:[#allocation8 + $0x3] ss:$8 sm:$0x3] }
 0x160   : > { %v1055_v7 = vadd.f32 %v1053_v51, %v1045_v26 }
 0x161   : > { %v505_v28 = vpop.permute.xlu2 %504 }
 0x162   : > { %v2381_v56 = vpop.permute.xlu1 %988  ;;  %v2385_v57 = vpop.permute.xlu0 %1113  ;;  %1225 = vrot.lane.b32.xlu2 %v1223_v3, %s1780_s30  ;;  %v1274_v42 = vstv %s1541_s5  ;;  %v506_v31 = vrot.slane %v505_v28, 1  ;;  %v918_v3 = vrot.slane %v2319_v20, 1 }
 0x163   : > { %v1275_v17 = vmul.f32 %v1274_v42, %v2133_v62  ;;  %v928_v62 = vrot.slane %v2367_v49, 7 }
 0x164   : > { %1143 = vrot.lane.b32.xlu0 %v1141_v6, %s1784_s8  ;;  %v508_v53 = vsel %vm507_vm9, %v505_v28, %v506_v31 }
 0x165   : > { %v510_v13 = vmul.f32 %v508_v53, %v2412_v40 }
 0x16a   : > { %v875_v23 = vpop.permute.xlu1 %874  ;;  %v2392_v27 = vpop.permute.xlu0 %998  ;;  %1297 = vrot.lane.b32.xlu2 %v1295_v24, %s1780_s30  ;;  %v980_v24 = vrot.slane %v2349_v30, 1 }
 0x16b   : > { %v876_v60 = vrot.slane %v875_v23, 7 }
 0x16c   : > { %1091 = vrot.lane.b32.xlu0 %v1089_v59, %s1783_s11  ;;  %v929_v59 = vsel %vm327_vm5, %v928_v62, %v2367_v49 }
 0x16d   : > { %v877_v0 = vsel %vm349_vm7, %v876_v60, %v875_v23  ;;  %v2436_v23 = vld [vmem:[#allocation8 + $0x5] ss:$8 sm:$0x3] }
 0x16e   : > { %v879_v5 = vadd.f32 %v877_v0, %v869_v21 }
 0x170   : > { %881 = vrot.lane.b32.xlu1 %v879_v5, %s1786_s4  ;;  %v970_v5 = vrot.slane %v2331_v61, 1  ;;  %s1538_s4 = sld [smem:[#allocation4 + $0x37]] }
 0x172   : > { %v1062_v8 = vpop.permute.xlu1 %1061  ;;  %v355_v12 = vpop.permute.xlu0 %354 }
 0x173   : > { %v1063_v10 = vrot.slane %v1062_v8, 7  ;;  %v356_v25 = vrot.slane %v355_v12, 1 }
 0x174   : > { %1277 = vrot.lane.b32.xlu0 %v1275_v17, %s1781_s25  ;;  %s1510_s25 = sld [smem:[#allocation4 + $0x33]] }
 0x175   : > { %v1064_v22 = vsel %vm314_vm4, %v1063_v10, %v1062_v8  ;;  %v358_v34 = vsel %vm357_vm8, %v355_v12, %v356_v25  ;;  %v939_v8 = vsel %vm338_vm6, %v938_v58, %v2379_v4  ;;  %v990_v4 = vrot.slane %v2381_v56, 1 }
 0x176   : > { %v2403_v29 = vadd.f32 %v1064_v22, %v1055_v7  ;;  %v360_v43 = vmul.f32 %v358_v34, %v2407_v32  ;;  %v919_v7 = vsel %vm314_vm4, %v2319_v20, %v918_v3  ;;  %v971_v22 = vsel %vm292_vm2, %v2331_v61, %v970_v5 }
 0x177   : > { %v921_v15 = vadd.f32 %v919_v7, %v2344_v14  ;;  %v991_v61 = vsel %vm314_vm4, %v2381_v56, %v990_v4 }
 0x179   : > { %v931_v42 = vadd.f32 %v929_v59, %v921_v15 }
 0x17a   : > { %v430_v33 = vpop.permute.xlu1 %429  ;;  %v961_v0 = vstv %s1510_s25  ;;  %s1721_s25 = scalar_lea.hbm %s2569_s3, 4 }
 0x17b   : > { %v431_v37 = vrot.slane %v430_v33, 1  ;;  %v962_v49 = vmul.f32 %v961_v0, %v2113_v11  ;;  %v941_v9 = vadd.f32 %v939_v8, %v931_v42 }
 0x17c   : > { %1287 = vrot.lane.b32.xlu0 %v1285_v38, %s1784_s8  ;;  %s1524_s8 = sld [smem:[#allocation4 + $0x35]] }
 0x17d   : > { %v433_v41 = vsel %vm432_vm10, %v430_v33, %v431_v37  ;;  %v973_v31 = vadd.f32 %v971_v22, %v962_v49  ;;  %v981_v33 = vsel %vm303_vm3, %v2349_v30, %v980_v24  ;;  %v1000_v37 = vrot.slane %v2392_v27, 7 }
 0x17e   : > { %v435_v44 = vmul.f32 %v433_v41, %v2410_v36  ;;  %v1115_v24 = vrot.slane %v2385_v57, 1 }
 0x17f   : > { %v983_v11 = vadd.f32 %v981_v33, %v973_v31  ;;  %v1125_v33 = vrot.slane %v2394_v63, 1 }
 0x180   : > { %v436_v46 = vadd.f32 %v435_v44, %v360_v43  ;;  %v1001_v44 = vsel %vm327_vm5, %v1000_v37, %v2392_v27  ;;  %v1116_v4 = vsel %vm292_vm2, %v2385_v57, %v1115_v24 }
 0x181   : > { %v993_v43 = vadd.f32 %v991_v61, %v983_v11 }
 0x182   : > { %v511_v50 = vadd.f32 %v510_v13, %v436_v46  ;;  %v1106_v22 = vstv %s1524_s8 }
 0x183   : > { %v1003_v45 = vadd.f32 %v1001_v44, %v993_v43  ;;  %v1126_v44 = vsel %vm303_vm3, %v2394_v63, %v1125_v33 }
 0x184   : > { %1307 = vrot.lane.b32.xlu0 %v1305_v48, %s1783_s11  ;;  %s1531_s11 = sld [smem:[#allocation4 + $0x36]] }
 0x186   : > { %v581_v51 = vpop.permute.xlu0 %580 }
 0x187   : > { %v582_v35 = vrot.slane %v581_v51, 1 }
 0x189   : > { %v583_v26 = vsel %vm338_vm6, %v581_v51, %v582_v35 }
 0x18a   : > { %v585_v39 = vmul.f32 %v583_v26, %v2422_v2  ;;  %v1178_v7 = vstv %s1531_s11 }
 0x18c   : > { %v586_v16 = vadd.f32 %v585_v39, %v511_v50  ;;  %v730_v1 = vpop.permute.xlu2 %729  ;;  %v2468_v39 = vld [vmem:[#allocation8 + $0x6] ss:$8 sm:$0x3] }
 0x18d   : > { %v731_v6 = vrot.slane %v730_v1, 1 }
 0x18f   : > { %v733_v20 = vsel %vm732_vm11, %v730_v1, %v731_v6 }
 0x190   : > { %v735_v17 = vmul.f32 %v733_v20, %v2436_v23 }
 0x194   : > { %v1009_v54 = vpop.permute.xlu2 %1008 }
 0x195   : > { %v1010_v41 = vrot.slane %v1009_v54, 7 }
 0x196   : > { %v655_v19 = vpop.permute.xlu1 %654 }
 0x197   : > { %v656_v55 = vrot.slane %v655_v19, 1  ;;  %v1011_v30 = vsel %vm338_vm6, %v1010_v41, %v1009_v54 }
 0x198   : > { %v1013_v48 = vadd.f32 %v1011_v30, %v1003_v45 }
 0x199   : > { %v658_v21 = vsel %vm657_vm12, %v655_v19, %v656_v55  ;;  %v2474_v19 = vld [vmem:[#allocation2 + $0x1] ss:$2 sm:$0x7] }
 0x19a   : > { %v660_v60 = vmul.f32 %v658_v21, %v2430_v52  ;;  %v1179_v55 = vmul.f32 %v2474_v19, %v1178_v7 }
 0x19c   : > { %v661_v14 = vadd.f32 %v660_v60, %v586_v16  ;;  %v1196_v12 = vpop.permute.xlu2 %1195 }
 0x19d   : > { %v1197_v6 = vrot.slane %v1196_v12, 1 }
 0x19e   : > { %v947_v10 = vpop.permute.xlu1 %946  ;;  %v736_v18 = vadd.f32 %v735_v17, %v661_v14 }
 0x19f   : > { %v948_v28 = vrot.slane %v947_v10, 7  ;;  %v1198_v20 = vsel %vm303_vm3, %v1196_v12, %v1197_v6 }
 0x1a1   : > { %v949_v25 = vsel %vm349_vm7, %v948_v28, %v947_v10 }
 0x1a2   : > { %v951_v38 = vadd.f32 %v949_v25, %v941_v9  ;;  %v1107_v25 = vmul.f32 %v2474_v19, %v1106_v22 }
 0x1a4   : > { %953 = vrot.lane.b32.xlu2 %v951_v38, %s1787_s7  ;;  %v2459_v53 = vpop.permute.xlu2 %1081  ;;  %v1118_v43 = vadd.f32 %v1116_v4, %v1107_v25  ;;  %s2580_s7 = smov 47  }
 0x1a6   : > { %v2454_v34 = vpop.permute.xlu1 %1133 }
 0x1a7   : > { %v1135_v37 = vrot.slane %v2454_v34, 7 }
 0x1a9   : > { %v1136_v30 = vsel %vm314_vm4, %v1135_v37, %v2454_v34 }
 0x1ac   : > { %v2465_v35 = vpop.permute.xlu2 %1267 }
 0x1ae   : > { %v1019_v13 = vpop.permute.xlu1 %1018 }
 0x1af   : > { %v1020_v46 = vrot.slane %v1019_v13, 7 }
 0x1b1   : > { %v1021_v50 = vsel %vm349_vm7, %v1020_v46, %v1019_v13  ;;  %v1128_v46 = vadd.f32 %v1126_v44, %v1118_v43 }
 0x1b2   : > { %v1023_v51 = vadd.f32 %v1021_v50, %v1013_v48 }
 0x1b4   : > { %1025 = vrot.lane.b32.xlu0 %v1023_v51, %s1788_s10  ;;  %v1216_v3 = vpop.permute.xlu2 %1215  ;;  %v1138_v51 = vadd.f32 %v1136_v30, %v1128_v46  ;;  %s1447_s10 = sshll.u32 %s1912_s12, 1 }
 0x1b5   : > { %v1217_v5 = vrot.slane %v1216_v3, 7  ;;  %s187_s26 = scalar_lea.vmem [#allocation10], %s1447_s10 }
 0x1b6   : > { %v1206_v56 = vpop.permute.xlu1 %1205  ;;  %v805_v26 = vpop.permute.xlu0 %804  ;;  %s1354_s22 = sshll.u32 %s187_s26, 4  ;;  %s1355_s22 = int_to_ptr.vmem [resolvable:$true] %s1354_s22 }
 0x1b7   : > { %v806_v27 = vrot.slane %v805_v26, 1  ;;  %v1207_v59 = vrot.slane %v1206_v56, 7  ;;  %v1218_v10 = vsel %vm327_vm5, %v1217_v5, %v1216_v3 }
 0x1b9   : > { %v808_v16 = vsel %vm807_vm13, %v805_v26, %v806_v27  ;;  %v1208_v0 = vsel %vm314_vm4, %v1207_v59, %v1206_v56  ;;  %v1083_v56 = vrot.slane %v2459_v53, 7 }
 0x1ba   : > { %v810_v1 = vmul.f32 %v808_v16, %v2468_v39 }
 0x1bb   : > { %v1084_v7 = vsel %vm338_vm6, %v1083_v56, %v2459_v53 }
 0x1bc   : > { %v2472_v62 = vadd.f32 %v810_v1, %v736_v18  ;;  %v1226_v14 = vpop.permute.xlu2 %1225 }
 0x1bd   : > { %v1227_v18 = vrot.slane %v1226_v14, 7 }
 0x1be   : > { %v1154_v54 = vpop.permute.xlu1 %1153  ;;  %v1186_v15 = vpop.permute.xlu0 %1185 }
 0x1bf   : > { %v1187_v58 = vrot.slane %v1186_v15, 1  ;;  %v1228_v12 = vsel %vm338_vm6, %v1227_v18, %v1226_v14  ;;  %v1155_v45 = vrot.slane %v1154_v54, 7 }
 0x1c1   : > { %v1188_v21 = vsel %vm292_vm2, %v1186_v15, %v1187_v58  ;;  %v1156_v26 = vsel %vm338_vm6, %v1155_v45, %v1154_v54 }
 0x1c2   : > { %v1190_v60 = vadd.f32 %v1188_v21, %v1179_v55 }
 0x1c4   : > { %v1200_v42 = vadd.f32 %v1198_v20, %v1190_v60  ;;  %v1250_v20 = vstv %s1538_s4 }
 0x1c6   : > { %v1164_v17 = vpop.permute.xlu1 %1163  ;;  %v1072_v8 = vpop.permute.xlu0 %1071  ;;  %v1210_v49 = vadd.f32 %v1208_v0, %v1200_v42  ;;  %v1269_v0 = vrot.slane %v2465_v35, 1 }
 0x1c7   : > { %v1073_v13 = vrot.slane %v1072_v8, 7  ;;  %v1165_v57 = vrot.slane %v1164_v17, 7 }
 0x1c8   : > { %v1220_v28 = vadd.f32 %v1218_v10, %v1210_v49 }
 0x1c9   : > { %v1074_v27 = vsel %vm327_vm5, %v1073_v13, %v1072_v8  ;;  %v1166_v1 = vsel %vm349_vm7, %v1165_v57, %v1164_v17  ;;  %v1270_v17 = vsel %vm303_vm3, %v2465_v35, %v1269_v0  ;;  %v1298_v8 = vpop.permute.xlu2 %1297 }
 0x1ca   : > { %v1230_v11 = vadd.f32 %v1228_v12, %v1220_v28  ;;  %v1076_v34 = vadd.f32 %v1074_v27, %v2403_v29  ;;  %v1251_v29 = vmul.f32 %v2474_v19, %v1250_v20  ;;  %v1299_v24 = vrot.slane %v1298_v8, 7 }
 0x1cc   : > { %v1086_v58 = vadd.f32 %v1084_v7, %v1076_v34  ;;  %v1300_v12 = vsel %vm338_vm6, %v1299_v24, %v1298_v8 }
 0x1ce   : > { %v1236_v9 = vpop.permute.xlu1 %1235  ;;  %v1258_v38 = vpop.permute.xlu0 %1257 }
 0x1cf   : > { %v1237_v31 = vrot.slane %v1236_v9, 7  ;;  %v1259_v21 = vrot.slane %v1258_v38, 1 }
 0x1d1   : > { %v1238_v61 = vsel %vm349_vm7, %v1237_v31, %v1236_v9  ;;  %v1260_v53 = vsel %vm292_vm2, %v1258_v38, %v1259_v21 }
 0x1d2   : > { %v1240_v41 = vadd.f32 %v1238_v61, %v1230_v11  ;;  %v1262_v42 = vadd.f32 %v1260_v53, %v1251_v29 }
 0x1d4   : > { %1242 = vrot.lane.b32.xlu0 %v1240_v41, %s1790_s23  ;;  %v1272_v18 = vadd.f32 %v1270_v17, %v1262_v42  ;;  %s1547_s23 = sshll.u32 %s1836_s0, 1  ;;  %s1342_s0 = scalar_lea.sflag [#allocation7], %s1912_s12 }
 0x1d5   : > { %s1352_s15 = scalar_lea.hbm %s2569_s3, %s1547_s23 }
 0x1d6   : > { %v1144_v48 = vpop.permute.xlu0 %1143  ;;  %s1356_s13 = sshll.u32 %s1352_s15, 4  ;;  %s1357_s13 = int_to_ptr.hbm [resolvable:$true] %s1356_s13 }
 0x1d7   : > { %v1145_v50 = vrot.slane %v1144_v48, 7  ;;  %s1715_s5 = sshra.s32 %s1357_s13, 4  ;;  %s1716_s5 = int_to_ptr.hbm [resolvable:$true] %s1715_s5 }
 0x1d8   : > { %s1717_s6 = scalar_lea.hbm %s1716_s5, 2  ;;  %p1722_p0 = scmp.lt.s32.totalorder %s1716_s5, %s2569_s3 }
 0x1d9   : > { %v1146_v63 = vsel %vm327_vm5, %v1145_v50, %v1144_v48  ;;  %p1718_p4 = scmp.ne.s32.totalorder %s1716_s5, %s1717_s6  ;;  %p1723_p7 = scmp.lt.s32.totalorder %s1721_s25, %s1717_s6 }
 0x1da   : > { %v1148_v16 = vadd.f32 %v1146_v63, %v1138_v51 }
 0x1db   : > { %p1719_p6 = pnand %p1718_p4, %p1867_p11  ;;  %p1724_p5 = por %p1723_p7, %p1722_p0 }
 0x1dc   : > { %v1158_v3 = vadd.f32 %v1156_v26, %v1148_v16 }
 0x1dd   : > { %p1720_p13 = pneg %p1719_p6 }
 0x1de   : > { %v1092_v6 = vpop.permute.xlu0 %1091  ;;  %v1168_v55 = vadd.f32 %v1166_v1, %v1158_v3 }
 0x1df   : > { %v1093_v15 = vrot.slane %v1092_v6, 7  ;;  %p1725_p8 = pnand %p1724_p5, %p1720_p13 }
 0x1e0   : > { %1170 = vrot.lane.b32.xlu2 %v1168_v55, %s2580_s7 }
 0x1e1   : > { %v1094_v54 = vsel %vm349_vm7, %v1093_v15, %v1092_v6 }
 0x1e2   : > { %v1096_v59 = vadd.f32 %v1094_v54, %v1086_v58  ;;  %v882_v35 = vpop.permute.xlu1 %881 }
 0x1e3   : > { %v883_v11 = vrot.slane %v882_v35, 1 }
 0x1e4   : > { %1098 = vrot.lane.b32.xlu1 %v1096_v59, %s1780_s30  ;;  %s2581_s30 = smov 45  }
 0x1e5   : > { %v884_v43 = vsel %vm357_vm8, %v882_v35, %v883_v11 }
 0x1e6   : > { %v1278_v60 = vpop.permute.xlu0 %1277  ;;  %v886_v13 = vmul.f32 %v884_v43, %v2407_v32 }
 0x1e7   : > { %v1279_v5 = vrot.slane %v1278_v60, 7 }
 0x1e8   : > { %v887_v51 = vadd.f32 %v886_v13, %v2472_v62 }
 0x1e9   : > { %v1280_v49 = vsel %vm314_vm4, %v1279_v5, %v1278_v60 }
 0x1ea   : > { %v1282_v28 = vadd.f32 %v1280_v49, %v1272_v18 }
 0x1ee   : > { %v1288_v14 = vpop.permute.xlu0 %1287 }
 0x1ef   : > { %v1289_v10 = vrot.slane %v1288_v14, 7 }
 0x1f1   : > { %v1290_v22 = vsel %vm327_vm5, %v1289_v10, %v1288_v14 }
 0x1f2   : > { %v1292_v19 = vadd.f32 %v1290_v22, %v1282_v28 }
 0x1f4   : > { %v1302_v31 = vadd.f32 %v1300_v12, %v1292_v19 }
 0x1f6   : > { %v1308_v9 = vpop.permute.xlu0 %1307 }
 0x1f7   : > { %v1309_v25 = vrot.slane %v1308_v9, 7 }
 0x1f9   : > { %v1310_v38 = vsel %vm349_vm7, %v1309_v25, %v1308_v9 }
 0x1fa   : > { %v1312_v33 = vadd.f32 %v1310_v38, %v1302_v31 }
 0x1fc   : > { %1314 = vrot.lane.b32.xlu1 %v1312_v33, %s2581_s30 }
 0x1fe   : > { %v954_v4 = vpop.permute.xlu2 %953 }
 0x1ff   : > { %v955_v37 = vrot.slane %v954_v4, 1 }
 0x201   : > { %v956_v30 = vsel %vm432_vm10, %v954_v4, %v955_v37 }
 0x202   : > { %v958_v48 = vmul.f32 %v956_v30, %v2410_v36 }
 0x204   : > { %v959_v27 = vadd.f32 %v958_v48, %v887_v51 }
 0x226   : > { %v1026_v61 = vpop.permute.xlu0 %1025 }
 0x227   : > { %v1027_v44 = vrot.slane %v1026_v61, 1 }
 0x229   : > { %v1028_v46 = vsel %vm507_vm9, %v1026_v61, %v1027_v44 }
 0x22a   : > { %v1030_v56 = vmul.f32 %v1028_v46, %v2412_v40 }
 0x22c   : > { %v1031_v1 = vadd.f32 %v1030_v56, %v959_v27 }
 0x23a   : > { %v1171_v57 = vpop.permute.xlu2 %1170 }
 0x23b   : > { %v1172_v26 = vrot.slane %v1171_v57, 1 }
 0x23d   : > { %v1173_v34 = vsel %vm657_vm12, %v1171_v57, %v1172_v26 }
 0x23e   : > { %v1175_v7 = vmul.f32 %v1173_v34, %v2430_v52 }
 0x246   : > { %v1243_v63 = vpop.permute.xlu0 %1242 }
 0x247   : > { %v1244_v32 = vrot.slane %v1243_v63, 1 }
 0x249   : > { %v1245_v36 = vsel %vm732_vm11, %v1243_v63, %v1244_v32 }
 0x24a   : > { %v1247_v40 = vmul.f32 %v1245_v36, %v2436_v23 }
 0x256   : > { %v1099_v41 = vpop.permute.xlu1 %1098 }
 0x257   : > { %v1100_v45 = vrot.slane %v1099_v41, 1 }
 0x259   : > { %v1101_v50 = vsel %vm338_vm6, %v1099_v41, %v1100_v45 }
 0x25a   : > { %v1103_v16 = vmul.f32 %v1101_v50, %v2422_v2 }
 0x25c   : > { %v1104_v3 = vadd.f32 %v1103_v16, %v1031_v1 }
 0x25e   : > { %v1176_v6 = vadd.f32 %v1175_v7, %v1104_v3 }
 0x260   : > { %v1248_v58 = vadd.f32 %v1247_v40, %v1176_v6 }
 0x26e   : > { %v1315_v62 = vpop.permute.xlu1 %1314 }
 0x26f   : > { %v1316_v55 = vrot.slane %v1315_v62, 1 }
 0x271   : > { %v1317_v15 = vsel %vm807_vm13, %v1315_v62, %v1316_v55 }
 0x272   : > { %v1319_v2 = vmul.f32 %v1317_v15, %v2468_v39 }
 0x274   : > { %v1320_v54 = vadd.f32 %v1319_v2, %v1248_v58 }
 0x276   : > { %v1545_v59 = vmul.f32 -1.442695, %v1320_v54 }
 0x278   : > { %1624 = vpow2.f32 %v1545_v59 }
 0x27e   : > { %v1625_v20 = vpop.eup %1624 }
 0x27f   : > { %v1324_v21 = vadd.f32 1.0, %v1625_v20 }
 0x281   : > { %1626 = vrcp.f32 %v1324_v21  ;;  %v1336_v23 = vand.u32 2147483648, %v1324_v21  ;;  %v1334_v39 = vand.u32 2147483647, %v1324_v21  ;;  %vm1330_vm15 = vweird.f32 %v1324_v21 }
 0x283   : > { %v1337_v5 = vor.u32 1.1754944e-38, %v1336_v23  ;;  %vm1335_vm2 = vcmp.eq.f32.partialorder %v1334_v39, 8.507059e+37 }
 0x287   : > { %v1627_v52 = vpop.eup %1626 }
 0x288   : > { %v1326_v60 = vmul.f32 %v1627_v52, %v1324_v21  ;;  %vm1331_vm14 = vweird.f32 %v1627_v52 }
 0x289   : > { %vm1332_vm0 = vmor %vm1330_vm15, %vm1331_vm14 }
 0x28a   : > { %v1327_v29 = vsub.f32 1.0, %v1326_v60 }
 0x28c   : > { %v1328_v0 = vmul.f32 %v1627_v52, %v1327_v29 }
 0x28e   : > { %v1329_v53 = vadd.f32 %v1627_v52, %v1328_v0 }
 0x290   : > { %v1333_v42 = vsel %vm1332_vm0, %v1627_v52, %v1329_v53 }
 0x291   : > { %v1338_v17 = vsel %vm1335_vm2, %v1337_v5, %v1333_v42 }
 0x292   : > { %1340 = vst.msk [vmem:[%s187_s26] sm:$0x3] %vm1990_vm1, %v1338_v17 }
 0x293   : > { %1728 = shalt.err (!%p1725_p8)
}
 0x294   : > { %1557 = dma.vmem_to_hbm [thread:$0]  (%p1867_p11), %s1355_s22, 32, %s1357_s13, %s1342_s0  }
 0x295 PF: > { %s1368_s12 = sand.u32 1, %s1761_s16   ;;  %p2582_p9 = scmp.ge.s32.totalorder %s1773_s19, 2 }
 0x296   : > { %s1369_s4 = scalar_lea.sflag [#allocation7], %s1368_s12 }
 0x297   : > { %p1568_p10 = pnand %p2582_p9, %p1871_p12 }
 0x299   : > { %p1569_p1 = pneg %p1568_p10 }
 0x29b   : > { %1756 = dma.done.wait (%p1569_p1), %s1369_s4, 32  }
 0x29c   : > { %1758 = vsyncadd (%p1569_p1), %s1369_s4, 4294967264  ;;  %p25_p2 = scmp.ge.s32.totalorder %s1840_s21, 4   ;;  %s2583_s16 = smov %s1765_s17 }
 0x29d   : > { %s2584_s17 = smov %s1769_s18  ;;  %s2585_s18 = smov %s1852_s24 }
 0x29e   : > { %s2586_s19 = smov %s1840_s21  ;;  %27 = sbr.rel (!%p25_p2) target bundleno = 12 (0xc), region = 88 }
 0x2a3   :  { %1375 = vsyncpa [#allocation6], 1 }
 0x2a4   :  { %1377 = vsyncpa [#allocation6 + $0x1], 1 }
 0x2a5   :  { %1378 = vsyncpa [#allocation9], 1 }
 0x2a6   :  { %1379 = vsyncpa [#allocation7], 1 }
 0x2a7   :  { %1381 = vsyncpa [#allocation7 + $0x1], 1 }

</bundles_post_ra>
